<compile_context>
chip_gen: v6e
topology: v6e:2x2x1
jax: 0.10.0
libtpu: 0.0.40
codegen_flags: <defaults>
</compile_context>

<pallas_src>
import functools

import jax
import jax.numpy as jnp
from jax import lax
from jax.experimental import pallas as pl
from jax.experimental.pallas import tpu as pltpu

_EPS = 1e-5                       # PyTorch LayerNorm default
_VMEM_LIMIT = 48 * 1024 * 1024    # <= v7x 64 MiB physical; plenty on v5e/v6e
_BF16 = jnp.bfloat16
_F32 = jnp.float32


# ----------------------------------------------------------------------------
# Tiling helpers
# ----------------------------------------------------------------------------

def _round_up(x, m):
    return (x + m - 1) // m * m


def _row_tile(m, cap=512):
    """Largest multiple-of-8 divisor of m (<= cap) leaving >= 2 grid steps.

    Falls back to the full extent when m cannot be split (block == array dim
    also satisfies the (8,128) rule)."""
    for t in (512, 256, 128, 64, 32, 16, 8):
        if t <= cap and m % t == 0 and m // t >= 2:
            return t
    return m


def _col_tile(n, cap=512):
    """Lane (last-dim) tile: whole thing if small, else a 128-multiple divisor."""
    if n <= cap:
        return n
    for t in (2048, 1024, 512, 384, 256, 128):
        if t <= cap and n % t == 0:
            return t
    return n


def _batch_block(B, T, S, row_target=256, row_cap=2048):
    """Sequences per MHA grid step: feed >= row_target rows to the MXU where
    possible while keeping >= 2 grid steps (v7x megacore) and bounded VMEM."""
    best = 1
    for bb in range(1, B + 1):
        if B % bb != 0:
            continue
        if bb > 1 and B // bb < 2:
            break
        if bb * max(T, S) > row_cap:
            break
        best = bb
        if bb * min(T, S) >= row_target:
            break
    return best


def _full_spec(shape):
    """BlockSpec that loads the whole (small) array once, same block every step."""
    return pl.BlockSpec(shape, lambda *_: (0,) * len(shape))


# ----------------------------------------------------------------------------
# In-kernel math helpers
# ----------------------------------------------------------------------------

def _layernorm_f32(z, g, b):
    mu = jnp.mean(z, axis=-1, keepdims=True)
    zc = z - mu
    var = jnp.mean(zc * zc, axis=-1, keepdims=True)
    return zc * lax.rsqrt(var + _EPS) * g + b


def _attention(q, k, v, wo, nhead):
    """q: (Bb,T,E) f32 (already scaled), k/v: (Bb,S,E) f32, wo: (E,E) bf16.
    Returns projected attention output, (Bb*T, E) f32 (no output bias)."""
    Bb, T, E = q.shape
    dh = E // nhead
    parts = []
    for h in range(nhead):
        sl = slice(h * dh, (h + 1) * dh)
        qh = q[..., sl].astype(_BF16)
        kh = k[..., sl].astype(_BF16)
        vh = v[..., sl].astype(_BF16)
        s = jnp.einsum('btd,bsd->bts', qh, kh, preferred_element_type=_F32)
        m = jnp.max(s, axis=-1, keepdims=True)
        p = jnp.exp(s - m)
        p = p / jnp.sum(p, axis=-1, keepdims=True)      # exact divide (parity)
        parts.append(jnp.einsum('bts,bsd->btd', p.astype(_BF16), vh,
                                preferred_element_type=_F32))
    # Assemble heads into one (Bb*T, E) context so the output projection is a
    # single K=E matmul instead of nhead K=dh matmuls against wo row slices.
    ctx = jnp.concatenate(parts, axis=-1).reshape(Bb * T, E)
    return jnp.dot(ctx.astype(_BF16), wo, preferred_element_type=_F32)


# ----------------------------------------------------------------------------
# Pallas kernels
# ----------------------------------------------------------------------------

def _self_mha_ln_kernel(x_ref, wqkv_ref, bqkv_ref, wo_ref, bo_ref, g_ref,
                        beta_ref, o_ref, *, nhead, scale):
    """LN(x + OutProj(SelfAttention(x))) for a block of Bb sequences."""
    Bb, T, E = x_ref.shape
    x_bf = x_ref[...]                                   # (Bb, T, E) bf16
    x2_bf = x_bf.reshape(Bb * T, E)
    # Fused QKV projection: one (Bb*T, E) @ (E, 3E) matmul.
    qkv = jnp.dot(x2_bf, wqkv_ref[...], preferred_element_type=_F32) + bqkv_ref[...]
    q = (qkv[:, :E] * scale).reshape(Bb, T, E)
    k = qkv[:, E:2 * E].reshape(Bb, T, E)
    v = qkv[:, 2 * E:].reshape(Bb, T, E)
    attn = _attention(q, k, v, wo_ref[...], nhead) + bo_ref[...]
    z = x2_bf.astype(_F32) + attn                       # residual (dropout = id)
    out = _layernorm_f32(z, g_ref[...], beta_ref[...])
    o_ref[...] = out.reshape(Bb, T, E).astype(o_ref.dtype)


def _cross_mha_ln_kernel(xq_ref, xkv_ref, wq_ref, bq_ref, wkv_ref, bkv_ref,
                         wo_ref, bo_ref, g_ref, beta_ref, o_ref, *, nhead, scale):
    """LN(xq + OutProj(Attention(xq, memory, memory))) for Bb sequences."""
    Bb, T, E = xq_ref.shape
    S = xkv_ref.shape[1]
    xq_bf = xq_ref[...].reshape(Bb * T, E)              # bf16
    xkv_bf = xkv_ref[...].reshape(Bb * S, E)            # bf16
    q = (jnp.dot(xq_bf, wq_ref[...], preferred_element_type=_F32)
         + bq_ref[...]) * scale
    kv = jnp.dot(xkv_bf, wkv_ref[...], preferred_element_type=_F32) + bkv_ref[...]
    q = q.reshape(Bb, T, E)
    k = kv[:, :E].reshape(Bb, S, E)
    v = kv[:, E:].reshape(Bb, S, E)
    attn = _attention(q, k, v, wo_ref[...], nhead) + bo_ref[...]
    z = xq_bf.astype(_F32) + attn
    out = _layernorm_f32(z, g_ref[...], beta_ref[...])
    o_ref[...] = out.reshape(Bb, T, E).astype(o_ref.dtype)


def _ffn_ln_kernel(x_ref, w1_ref, b1_ref, w2_ref, b2_ref, g_ref, beta_ref,
                   o_ref, acc_ref):
    """Fused FFN: LN(x + w2(relu(w1(x)))) with FF as a reduction grid axis."""
    kk = pl.program_id(1)

    @pl.when(kk == 0)
    def _():
        acc_ref[...] = jnp.zeros_like(acc_ref)

    x_bf = x_ref[...]                                   # (tm, E) bf16
    h = jnp.dot(x_bf, w1_ref[...], preferred_element_type=_F32) + b1_ref[...]
    h = jnp.maximum(h, 0.0)                             # (tm, tf)
    acc_ref[...] += jnp.dot(h.astype(_BF16), w2_ref[...],
                            preferred_element_type=_F32)

    @pl.when(kk == pl.num_programs(1) - 1)
    def _():
        z = x_bf.astype(_F32) + acc_ref[...] + b2_ref[...]
        o_ref[...] = _layernorm_f32(z, g_ref[...], beta_ref[...]).astype(o_ref.dtype)


def _ln_kernel(x_ref, g_ref, b_ref, o_ref):
    """Plain LayerNorm (encoder final norm)."""
    x = x_ref[...].astype(_F32)
    o_ref[...] = _layernorm_f32(x, g_ref[...], b_ref[...]).astype(o_ref.dtype)


def _ln_vocab_kernel(x_ref, g_ref, b_ref, w_ref, bias_ref, o_ref, xn_ref):
    """Decoder final norm + vocab projection. LN computed once per row tile
    (cached in VMEM scratch at j==0) and reused for every vocab column tile."""
    j = pl.program_id(1)

    @pl.when(j == 0)
    def _():
        xn = _layernorm_f32(x_ref[...].astype(_F32), g_ref[...], b_ref[...])
        xn_ref[...] = xn.astype(_BF16)

    o_ref[...] = jnp.dot(xn_ref[...], w_ref[...],
                         preferred_element_type=_F32) + bias_ref[...]


# ----------------------------------------------------------------------------
# pallas_call wrappers
# ----------------------------------------------------------------------------

def self_mha_block(x, p, ln_g, ln_b, nhead):
    """x: (B, T, E) bf16 -> LN(x + SelfMHA(x)): (B, T, E) bf16."""
    B, T, E = x.shape
    Bb = _batch_block(B, T, T)
    M = B * T
    kernel = functools.partial(_self_mha_ln_kernel, nhead=nhead,
                               scale=(E // nhead) ** -0.5)
    cost = pl.CostEstimate(
        flops=2 * M * E * 3 * E + 4 * B * T * T * E + 2 * M * E * E,
        transcendentals=B * nhead * T * T,
        bytes_accessed=2 * M * E * 2 + 4 * E * E * 2 + 8 * E * 4)
    return pl.pallas_call(
        kernel,
        grid=(B // Bb,),
        in_specs=[
            pl.BlockSpec((Bb, T, E), lambda b: (b, 0, 0)),
            _full_spec((E, 3 * E)),     # wqkv (bf16)
            _full_spec((1, 3 * E)),     # bqkv
            _full_spec((E, E)),         # wo (bf16)
            _full_spec((1, E)),         # bo
            _full_spec((1, E)),         # ln gamma
            _full_spec((1, E)),         # ln beta
        ],
        out_specs=pl.BlockSpec((Bb, T, E), lambda b: (b, 0, 0)),
        out_shape=jax.ShapeDtypeStruct((B, T, E), _BF16),
        compiler_params=pltpu.CompilerParams(
            dimension_semantics=("parallel",),
            vmem_limit_bytes=_VMEM_LIMIT),
        cost_estimate=cost,
    )(x, p["wqkv"], p["bqkv"], p["wo"], p["bo"], ln_g, ln_b)


def cross_mha_block(xq, memory, p, ln_g, ln_b, nhead):
    """xq: (B, T, E) bf16, memory: (B, S, E) bf16 -> (B, T, E) bf16."""
    B, T, E = xq.shape
    S = memory.shape[1]
    Bb = _batch_block(B, T, S)
    M = B * T
    kernel = functools.partial(_cross_mha_ln_kernel, nhead=nhead,
                               scale=(E // nhead) ** -0.5)
    cost = pl.CostEstimate(
        flops=2 * M * E * E + 2 * B * S * E * 2 * E + 4 * B * T * S * E
              + 2 * M * E * E,
        transcendentals=B * nhead * T * S,
        bytes_accessed=(2 * M + B * S) * E * 2 + 4 * E * E * 2 + 8 * E * 4)
    return pl.pallas_call(
        kernel,
        grid=(B // Bb,),
        in_specs=[
            pl.BlockSpec((Bb, T, E), lambda b: (b, 0, 0)),   # queries
            pl.BlockSpec((Bb, S, E), lambda b: (b, 0, 0)),   # memory
            _full_spec((E, E)),         # wq (bf16)
            _full_spec((1, E)),         # bq
            _full_spec((E, 2 * E)),     # wkv (bf16)
            _full_spec((1, 2 * E)),     # bkv
            _full_spec((E, E)),         # wo (bf16)
            _full_spec((1, E)),         # bo
            _full_spec((1, E)),         # ln gamma
            _full_spec((1, E)),         # ln beta
        ],
        out_specs=pl.BlockSpec((Bb, T, E), lambda b: (b, 0, 0)),
        out_shape=jax.ShapeDtypeStruct((B, T, E), _BF16),
        compiler_params=pltpu.CompilerParams(
            dimension_semantics=("parallel",),
            vmem_limit_bytes=_VMEM_LIMIT),
        cost_estimate=cost,
    )(xq, memory, p["wq"], p["bq"], p["wkv"], p["bkv"], p["wo"], p["bo"],
      ln_g, ln_b)


def ffn_block(x2d, w1, b1, w2, b2, ln_g, ln_b):
    """x2d: (M, E) bf16 -> LN(x + w2(relu(w1(x)))): (M, E) bf16."""
    M, E = x2d.shape
    FF = w1.shape[1]
    tm = _row_tile(M)
    tf = _col_tile(FF, cap=2048)
    cost = pl.CostEstimate(
        flops=4 * M * E * FF,
        transcendentals=0,
        bytes_accessed=2 * M * E * 2 + 2 * E * FF * 2 + (FF + 3 * E) * 4)
    return pl.pallas_call(
        _ffn_ln_kernel,
        grid=(M // tm, FF // tf),
        in_specs=[
            pl.BlockSpec((tm, E), lambda i, k: (i, 0)),
            pl.BlockSpec((E, tf), lambda i, k: (0, k)),    # w1 column tiles
            pl.BlockSpec((1, tf), lambda i, k: (0, k)),    # b1
            pl.BlockSpec((tf, E), lambda i, k: (k, 0)),    # w2 row tiles
            _full_spec((1, E)),         # b2
            _full_spec((1, E)),         # ln gamma
            _full_spec((1, E)),         # ln beta
        ],
        out_specs=pl.BlockSpec((tm, E), lambda i, k: (i, 0)),
        out_shape=jax.ShapeDtypeStruct((M, E), _BF16),
        scratch_shapes=[pltpu.VMEM((tm, E), _F32)],
        compiler_params=pltpu.CompilerParams(
            dimension_semantics=("parallel", "arbitrary"),
            vmem_limit_bytes=_VMEM_LIMIT),
        cost_estimate=cost,
    )(x2d, w1, b1, w2, b2, ln_g, ln_b)


def layernorm(x2d, gamma, beta):
    """Standalone LayerNorm (encoder final norm): (M, E) bf16 -> (M, E) bf16."""
    M, E = x2d.shape
    tm = _row_tile(M)
    return pl.pallas_call(
        _ln_kernel,
        grid=(M // tm,),
        in_specs=[pl.BlockSpec((tm, E), lambda i: (i, 0)),
                  _full_spec((1, E)),
                  _full_spec((1, E))],
        out_specs=pl.BlockSpec((tm, E), lambda i: (i, 0)),
        out_shape=jax.ShapeDtypeStruct((M, E), _BF16),
        compiler_params=pltpu.CompilerParams(
            dimension_semantics=("parallel",),
            vmem_limit_bytes=_VMEM_LIMIT),
    )(x2d, gamma, beta)


def final_ln_linear(x2d, gamma, beta, w, bias):
    """LN(x) @ w + bias over a 128-padded vocab, tiled (rows, vocab columns)."""
    M, E = x2d.shape
    V = w.shape[1]                       # already padded to a multiple of 128
    tm = _row_tile(M, cap=1024)          # bigger row tiles amortize weight stream
    tn = _col_tile(V, cap=512)
    cost = pl.CostEstimate(
        flops=2 * M * E * V,
        transcendentals=0,
        bytes_accessed=M * E * 2 + E * V * 2 + M * V * 4)
    return pl.pallas_call(
        _ln_vocab_kernel,
        grid=(M // tm, V // tn),
        in_specs=[
            pl.BlockSpec((tm, E), lambda i, j: (i, 0)),
            _full_spec((1, E)),
            _full_spec((1, E)),
            pl.BlockSpec((E, tn), lambda i, j: (0, j)),    # stream weight columns
            pl.BlockSpec((1, tn), lambda i, j: (0, j)),
        ],
        out_specs=pl.BlockSpec((tm, tn), lambda i, j: (i, j)),
        out_shape=jax.ShapeDtypeStruct((M, V), _F32),
        scratch_shapes=[pltpu.VMEM((tm, E), _BF16)],       # cached normalized tile
        compiler_params=pltpu.CompilerParams(
            dimension_semantics=("parallel", "arbitrary"),
            vmem_limit_bytes=_VMEM_LIMIT),
        cost_estimate=cost,
    )(x2d, gamma, beta, w, bias)


# ----------------------------------------------------------------------------
# Model glue (plain JAX for embedding gather + layout; kernels for the rest)
# ----------------------------------------------------------------------------

def encoder_layer(x, p, nhead):
    x = self_mha_block(x, p["self_attn"], p["ln1_g"], p["ln1_b"], nhead)
    B, S, E = x.shape
    x = ffn_block(x.reshape(B * S, E), p["w1"], p["b1"], p["w2"], p["b2"],
                  p["ln2_g"], p["ln2_b"]).reshape(B, S, E)
    return x


def decoder_layer(y, memory, p, nhead):
    y = self_mha_block(y, p["self_attn"], p["ln1_g"], p["ln1_b"], nhead)
    y = cross_mha_block(y, memory, p["cross_attn"], p["ln2_g"], p["ln2_b"], nhead)
    B, T, E = y.shape
    y = ffn_block(y.reshape(B * T, E), p["w1"], p["b1"], p["w2"], p["b2"],
                  p["ln3_g"], p["ln3_b"]).reshape(B, T, E)
    return y


def transformer_forward(params, src_tokens, tgt_tokens, nhead):
    """src_tokens: (S, N) int32, tgt_tokens: (T, N) int32 -> (T, N, trg_vocab)."""
    E = params["src_embed"].shape[1]
    V = params["trg_embed"].shape[0]      # true (unpadded) target vocab size

    # Embedding lookups; batch-first (N, seq, E) bf16 residual stream between
    # kernels (all epilogue math stays f32 inside the fused kernels).
    src = jnp.take(params["src_embed"], src_tokens.T, axis=0).astype(_BF16)
    tgt = jnp.take(params["trg_embed"], tgt_tokens.T, axis=0).astype(_BF16)

    # Encoder stack + final norm.
    x = src
    for lp in params["encoder_layers"]:
        x = encoder_layer(x, lp, nhead)
    B, S, _ = x.shape
    memory = layernorm(x.reshape(B * S, E),
                       params["enc_norm_g"], params["enc_norm_b"]).reshape(B, S, E)

    # Decoder stack; final norm fused into the vocab projection.
    y = tgt
    for lp in params["decoder_layers"]:
        y = decoder_layer(y, memory, lp, nhead)
    T = y.shape[1]
    logits = final_ln_linear(y.reshape(B * T, E),
                             params["dec_norm_g"], params["dec_norm_b"],
                             params["fc_w"], params["fc_b"])       # (B*T, Vpad)
    logits = logits[:, :V]                                         # drop padding
    return logits.reshape(B, T, V).transpose(1, 0, 2)              # (T, N, V)


# ----------------------------------------------------------------------------
# Deterministic parameter init (xavier-uniform 2-D weights, zero biases,
# ones/zeros LayerNorm). Matmul weights stored in bf16; epilogue params f32.
# ----------------------------------------------------------------------------

def _xavier(key, shape):
    fan_in, fan_out = shape
    bound = (6.0 / (fan_in + fan_out)) ** 0.5
    return jax.random.uniform(key, shape, _F32, -bound, bound)


def _init_self_attn(key, E):
    ks = jax.random.split(key, 4)
    wq, wk, wv = (_xavier(k, (E, E)) for k in ks[:3])
    return {
        "wqkv": jnp.concatenate([wq, wk, wv], axis=1).astype(_BF16),   # (E, 3E)
        "bqkv": jnp.zeros((1, 3 * E), _F32),
        "wo": _xavier(ks[3], (E, E)).astype(_BF16),
        "bo": jnp.zeros((1, E), _F32),
    }


def _init_cross_attn(key, E):
    ks = jax.random.split(key, 4)
    return {
        "wq": _xavier(ks[0], (E, E)).astype(_BF16),
        "bq": jnp.zeros((1, E), _F32),
        "wkv": jnp.concatenate([_xavier(ks[1], (E, E)), _xavier(ks[2], (E, E))],
                               axis=1).astype(_BF16),                  # (E, 2E)
        "bkv": jnp.zeros((1, 2 * E), _F32),
        "wo": _xavier(ks[3], (E, E)).astype(_BF16),
        "bo": jnp.zeros((1, E), _F32),
    }


def _init_enc_layer(key, E, FF):
    ks = jax.random.split(key, 3)
    return {
        "self_attn": _init_self_attn(ks[0], E),
        "w1": _xavier(ks[1], (E, FF)).astype(_BF16),
        "b1": jnp.zeros((1, FF), _F32),
        "w2": _xavier(ks[2], (FF, E)).astype(_BF16),
        "b2": jnp.zeros((1, E), _F32),
        "ln1_g": jnp.ones((1, E), _F32), "ln1_b": jnp.zeros((1, E), _F32),
        "ln2_g": jnp.ones((1, E), _F32), "ln2_b": jnp.zeros((1, E), _F32),
    }


def _init_dec_layer(key, E, FF):
    ks = jax.random.split(key, 4)
    return {
        "self_attn": _init_self_attn(ks[0], E),
        "cross_attn": _init_cross_attn(ks[1], E),
        "w1": _xavier(ks[2], (E, FF)).astype(_BF16),
        "b1": jnp.zeros((1, FF), _F32),
        "w2": _xavier(ks[3], (FF, E)).astype(_BF16),
        "b2": jnp.zeros((1, E), _F32),
        "ln1_g": jnp.ones((1, E), _F32), "ln1_b": jnp.zeros((1, E), _F32),
        "ln2_g": jnp.ones((1, E), _F32), "ln2_b": jnp.zeros((1, E), _F32),
        "ln3_g": jnp.ones((1, E), _F32), "ln3_b": jnp.zeros((1, E), _F32),
    }


def init_transformer_params(key, src_vocab, trg_vocab, E, FF, n_enc, n_dec):
    ks = jax.random.split(key, 4 + n_enc + n_dec)
    # Pad the vocab projection to a multiple of 128 (lane-dense output stores);
    # padded logits are sliced off after the kernel.
    Vp = _round_up(trg_vocab, 128)
    fc_w = _xavier(ks[2], (E, trg_vocab))
    fc_w = jnp.pad(fc_w, ((0, 0), (0, Vp - trg_vocab)))
    return {
        "src_embed": _xavier(ks[0], (src_vocab, E)),
        "trg_embed": _xavier(ks[1], (trg_vocab, E)),
        "fc_w": fc_w.astype(_BF16),                       # (E, Vp)
        "fc_b": jnp.zeros((1, Vp), _F32),
        "enc_norm_g": jnp.ones((1, E), _F32),
        "enc_norm_b": jnp.zeros((1, E), _F32),
        "dec_norm_g": jnp.ones((1, E), _F32),
        "dec_norm_b": jnp.zeros((1, E), _F32),
        "encoder_layers": [_init_enc_layer(ks[4 + i], E, FF) for i in range(n_enc)],
        "decoder_layers": [_init_dec_layer(ks[4 + n_enc + i], E, FF)
                           for i in range(n_dec)],
    }


# ----------------------------------------------------------------------------

if __name__ == "__main__":
    # Small, module-consistent shapes.
    SRC_VOCAB, TRG_VOCAB = 17, 19
    EMB_DIM, NHEAD, FF = 32, 4, 64
    N_ENC, N_DEC = 2, 2
    S, T, N = 8, 8, 2   # src seq len, tgt seq len, batch

    key = jax.random.PRNGKey(0)
    kp, ksrc, ktgt = jax.random.split(key, 3)
    params = init_transformer_params(kp, SRC_VOCAB, TRG_VOCAB, EMB_DIM, FF,
                                     N_ENC, N_DEC)

    src_tokens = jax.random.randint(ksrc, (S, N), 0, SRC_VOCAB, dtype=jnp.int32)
    tgt_tokens = jax.random.randint(ktgt, (T, N), 0, TRG_VOCAB, dtype=jnp.int32)

    fwd = jax.jit(functools.partial(transformer_forward, nhead=NHEAD))
    out = fwd(params, src_tokens, tgt_tokens)
    out = jax.block_until_ready(out)

    assert out.shape == (T, N, TRG_VOCAB), out.shape
    assert out.dtype == jnp.float32
    assert bool(jnp.all(jnp.isfinite(out)))
    print("KERNEL_OK")
</pallas_src>

<mosaic_0001>
module attributes {stable_mosaic.version = 11 : i64} {
  func.func @_ffn_ln_kernel(%arg0: i32, %arg1: i32, %arg2: memref<8x32xbf16, #tpu.memory_space<vmem>>, %arg3: memref<32x64xbf16, #tpu.memory_space<vmem>>, %arg4: memref<1x64xf32, #tpu.memory_space<vmem>>, %arg5: memref<64x32xbf16, #tpu.memory_space<vmem>>, %arg6: memref<1x32xf32, #tpu.memory_space<vmem>>, %arg7: memref<1x32xf32, #tpu.memory_space<vmem>>, %arg8: memref<1x32xf32, #tpu.memory_space<vmem>>, %arg9: memref<8x32xbf16, #tpu.memory_space<vmem>>, %arg10: memref<8x32xf32, #tpu.memory_space<vmem>>) attributes {dimension_semantics = [#tpu.dimension_semantics<parallel>, #tpu.dimension_semantics<arbitrary>], iteration_bounds = array<i64: 2, 1>, scalar_prefetch = 0 : i64, scratch_operands = 1 : i64, tpu.core_type = #tpu.core_type<tc>, window_params = [{transform_indices = @transform_0, window_bounds = array<i64: 8, 32>}, {transform_indices = @transform_1, window_bounds = array<i64: 32, 64>}, {transform_indices = @transform_2, window_bounds = array<i64: 1, 64>}, {transform_indices = @transform_3, window_bounds = array<i64: 64, 32>}, {pipeline_mode = #tpu.pipeline_mode<synchronous>, transform_indices = @transform_4, window_bounds = array<i64: 1, 32>}, {pipeline_mode = #tpu.pipeline_mode<synchronous>, transform_indices = @transform_5, window_bounds = array<i64: 1, 32>}, {pipeline_mode = #tpu.pipeline_mode<synchronous>, transform_indices = @transform_6, window_bounds = array<i64: 1, 32>}, {transform_indices = @transform_7, window_bounds = array<i64: 8, 32>}]} {
    %c0_i32 = arith.constant 0 : i32
    %0 = arith.cmpi eq, %arg1, %c0_i32 : i32
    %1 = arith.extui %0 : i1 to i32
    %c0_i32_0 = arith.constant 0 : i32
    %2 = arith.cmpi ne, %1, %c0_i32_0 : i32
    scf.if %2 {
      %cst_16 = arith.constant 0.000000e+00 : f32
      %20 = vector.broadcast %cst_16 : f32 to vector<8x32xf32>
      %c0_17 = arith.constant 0 : index
      %c0_18 = arith.constant 0 : index
      %21 = vector.load %arg10[%c0_17, %c0_18] : memref<8x32xf32, #tpu.memory_space<vmem>>, vector<8x32xf32>
      tpu.vector_store %arg10[%c0_17, %c0_18], %20 {strides = array<i32>} : memref<8x32xf32, #tpu.memory_space<vmem>>, vector<8x32xf32>,
    } else {
    }
    %c0 = arith.constant 0 : index
    %c0_1 = arith.constant 0 : index
    %3 = vector.load %arg2[%c0, %c0_1] : memref<8x32xbf16, #tpu.memory_space<vmem>>, vector<8x32xbf16>
    %c0_2 = arith.constant 0 : index
    %c0_3 = arith.constant 0 : index
    %4 = vector.load %arg3[%c0_2, %c0_3] : memref<32x64xbf16, #tpu.memory_space<vmem>>, vector<32x64xbf16>
    %cst = arith.constant dense<0.000000e+00> : vector<8x64xf32>
    %5 = tpu.matmul %3, %4, %cst {dimension_numbers = #tpu.dot_dimension_numbers<[1], [0], [0], [1], [0, 0, 1, 1], [], []>} : vector<8x32xbf16>, vector<32x64xbf16>, vector<8x64xf32> -> vector<8x64xf32>
    %c0_4 = arith.constant 0 : index
    %c0_5 = arith.constant 0 : index
    %6 = vector.load %arg4[%c0_4, %c0_5] : memref<1x64xf32, #tpu.memory_space<vmem>>, vector<1x64xf32>
    %7 = vector.broadcast %6 : vector<1x64xf32> to vector<8x64xf32>
    %8 = arith.addf %5, %7 : vector<8x64xf32>
    %cst_6 = arith.constant 0.000000e+00 : f32
    %9 = vector.broadcast %cst_6 : f32 to vector<8x64xf32>
    %10 = arith.maximumf %8, %9 : vector<8x64xf32>
    %c0_7 = arith.constant 0 : index
    %c0_8 = arith.constant 0 : index
    %11 = vector.load %arg10[%c0_7, %c0_8] : memref<8x32xf32, #tpu.memory_space<vmem>>, vector<8x32xf32>
    %12 = arith.truncf %10 : vector<8x64xf32> to vector<8x64xbf16>
    %c0_9 = arith.constant 0 : index
    %c0_10 = arith.constant 0 : index
    %13 = vector.load %arg5[%c0_9, %c0_10] : memref<64x32xbf16, #tpu.memory_space<vmem>>, vector<64x32xbf16>
    %cst_11 = arith.constant dense<0.000000e+00> : vector<8x32xf32>
    %14 = tpu.matmul %12, %13, %cst_11 {dimension_numbers = #tpu.dot_dimension_numbers<[1], [0], [0], [1], [0, 0, 1, 1], [], []>} : vector<8x64xbf16>, vector<64x32xbf16>, vector<8x32xf32> -> vector<8x32xf32>
    %15 = arith.addf %11, %14 : vector<8x32xf32>
    %c0_12 = arith.constant 0 : index
    %c0_13 = arith.constant 0 : index
    %16 = vector.load %arg10[%c0_12, %c0_13] : memref<8x32xf32, #tpu.memory_space<vmem>>, vector<8x32xf32>
    tpu.vector_store %arg10[%c0_12, %c0_13], %15 {strides = array<i32>} : memref<8x32xf32, #tpu.memory_space<vmem>>, vector<8x32xf32>,
    %c0_i32_14 = arith.constant 0 : i32
    %17 = arith.cmpi eq, %arg1, %c0_i32_14 : i32
    %18 = arith.extui %17 : i1 to i32
    %c0_i32_15 = arith.constant 0 : i32
    %19 = arith.cmpi ne, %18, %c0_i32_15 : i32
    scf.if %19 {
      %20 = arith.extf %3 : vector<8x32xbf16> to vector<8x32xf32>
      %c0_16 = arith.constant 0 : index
      %c0_17 = arith.constant 0 : index
      %21 = vector.load %arg10[%c0_16, %c0_17] : memref<8x32xf32, #tpu.memory_space<vmem>>, vector<8x32xf32>
      %22 = arith.addf %20, %21 : vector<8x32xf32>
      %c0_18 = arith.constant 0 : index
      %c0_19 = arith.constant 0 : index
      %23 = vector.load %arg6[%c0_18, %c0_19] : memref<1x32xf32, #tpu.memory_space<vmem>>, vector<1x32xf32>
      %24 = vector.broadcast %23 : vector<1x32xf32> to vector<8x32xf32>
      %25 = arith.addf %22, %24 : vector<8x32xf32>
      %c0_20 = arith.constant 0 : index
      %c0_21 = arith.constant 0 : index
      %26 = vector.load %arg7[%c0_20, %c0_21] : memref<1x32xf32, #tpu.memory_space<vmem>>, vector<1x32xf32>
      %c0_22 = arith.constant 0 : index
      %c0_23 = arith.constant 0 : index
      %27 = vector.load %arg8[%c0_22, %c0_23] : memref<1x32xf32, #tpu.memory_space<vmem>>, vector<1x32xf32>
      %cst_24 = arith.constant dense<0.000000e+00> : vector<8xf32>
      %28 = vector.multi_reduction <add>, %25, %cst_24 [1] : vector<8x32xf32> to vector<8xf32>
      %29 = vector.shape_cast %28 : vector<8xf32> to vector<8x1xf32>
      %cst_25 = arith.constant 3.200000e+01 : f32
      %30 = vector.broadcast %cst_25 : f32 to vector<8x1xf32>
      %31 = arith.divf %29, %30 : vector<8x1xf32>
      %32 = vector.broadcast %31 : vector<8x1xf32> to vector<8x32xf32>
      %33 = arith.subf %25, %32 : vector<8x32xf32>
      %34 = arith.mulf %33, %33 : vector<8x32xf32>
      %cst_26 = arith.constant dense<0.000000e+00> : vector<8xf32>
      %35 = vector.multi_reduction <add>, %34, %cst_26 [1] : vector<8x32xf32> to vector<8xf32>
      %36 = vector.shape_cast %35 : vector<8xf32> to vector<8x1xf32>
      %cst_27 = arith.constant 3.200000e+01 : f32
      %37 = vector.broadcast %cst_27 : f32 to vector<8x1xf32>
      %38 = arith.divf %36, %37 : vector<8x1xf32>
      %cst_28 = arith.constant 9.99999974E-6 : f32
      %39 = vector.broadcast %cst_28 : f32 to vector<8x1xf32>
      %40 = arith.addf %38, %39 : vector<8x1xf32>
      %41 = math.rsqrt %40 : vector<8x1xf32>
      %42 = vector.broadcast %41 : vector<8x1xf32> to vector<8x32xf32>
      %43 = arith.mulf %33, %42 : vector<8x32xf32>
      %44 = vector.broadcast %26 : vector<1x32xf32> to vector<8x32xf32>
      %45 = arith.mulf %43, %44 : vector<8x32xf32>
      %46 = vector.broadcast %27 : vector<1x32xf32> to vector<8x32xf32>
      %47 = arith.addf %45, %46 : vector<8x32xf32>
      %48 = arith.truncf %47 : vector<8x32xf32> to vector<8x32xbf16>
      %c0_29 = arith.constant 0 : index
      %c0_30 = arith.constant 0 : index
      %49 = vector.load %arg9[%c0_29, %c0_30] : memref<8x32xbf16, #tpu.memory_space<vmem>>, vector<8x32xbf16>
      tpu.vector_store %arg9[%c0_29, %c0_30], %48 {strides = array<i32>} : memref<8x32xbf16, #tpu.memory_space<vmem>>, vector<8x32xbf16>,
    } else {
    }
    return
  }
  func.func @transform_0(%arg0: i32, %arg1: i32) -> (i32, i32) {
    %c0_i32 = arith.constant 0 : i32
    %c0_i32_0 = arith.constant 0 : i32
    return %arg0, %c0_i32 : i32, i32
  }
  func.func @transform_1(%arg0: i32, %arg1: i32) -> (i32, i32) {
    %c0_i32 = arith.constant 0 : i32
    %c0_i32_0 = arith.constant 0 : i32
    return %c0_i32, %arg1 : i32, i32
  }
  func.func @transform_2(%arg0: i32, %arg1: i32) -> (i32, i32) {
    %c0_i32 = arith.constant 0 : i32
    %c0_i32_0 = arith.constant 0 : i32
    return %c0_i32, %arg1 : i32, i32
  }
  func.func @transform_3(%arg0: i32, %arg1: i32) -> (i32, i32) {
    %c0_i32 = arith.constant 0 : i32
    %c0_i32_0 = arith.constant 0 : i32
    return %arg1, %c0_i32 : i32, i32
  }
  func.func @transform_4(%arg0: i32, %arg1: i32) -> (i32, i32) {
    %c0_i32 = arith.constant 0 : i32
    %c0_i32_0 = arith.constant 0 : i32
    %c0_i32_1 = arith.constant 0 : i32
    return %c0_i32, %c0_i32_0 : i32, i32
  }
  func.func @transform_5(%arg0: i32, %arg1: i32) -> (i32, i32) {
    %c0_i32 = arith.constant 0 : i32
    %c0_i32_0 = arith.constant 0 : i32
    %c0_i32_1 = arith.constant 0 : i32
    return %c0_i32, %c0_i32_0 : i32, i32
  }
  func.func @transform_6(%arg0: i32, %arg1: i32) -> (i32, i32) {
    %c0_i32 = arith.constant 0 : i32
    %c0_i32_0 = arith.constant 0 : i32
    %c0_i32_1 = arith.constant 0 : i32
    return %c0_i32, %c0_i32_0 : i32, i32
  }
  func.func @transform_7(%arg0: i32, %arg1: i32) -> (i32, i32) {
    %c0_i32 = arith.constant 0 : i32
    %c0_i32_0 = arith.constant 0 : i32
    return %arg0, %c0_i32 : i32, i32
  }
}

module attributes {stable_mosaic.version = 11 : i64} {
  func.func @_self_mha_ln_kernel(%arg0: i32, %arg1: memref<1x8x32xbf16, #tpu.memory_space<vmem>>, %arg2: memref<32x96xbf16, #tpu.memory_space<vmem>>, %arg3: memref<1x96xf32, #tpu.memory_space<vmem>>, %arg4: memref<32x32xbf16, #tpu.memory_space<vmem>>, %arg5: memref<1x32xf32, #tpu.memory_space<vmem>>, %arg6: memref<1x32xf32, #tpu.memory_space<vmem>>, %arg7: memref<1x32xf32, #tpu.memory_space<vmem>>, %arg8: memref<1x8x32xbf16, #tpu.memory_space<vmem>>) attributes {dimension_semantics = [#tpu.dimension_semantics<parallel>], iteration_bounds = array<i64: 2>, scalar_prefetch = 0 : i64, scratch_operands = 0 : i64, tpu.core_type = #tpu.core_type<tc>, window_params = [{transform_indices = @transform_0, window_bounds = array<i64: 1, 8, 32>}, {pipeline_mode = #tpu.pipeline_mode<synchronous>, transform_indices = @transform_1, window_bounds = array<i64: 32, 96>}, {pipeline_mode = #tpu.pipeline_mode<synchronous>, transform_indices = @transform_2, window_bounds = array<i64: 1, 96>}, {pipeline_mode = #tpu.pipeline_mode<synchronous>, transform_indices = @transform_3, window_bounds = array<i64: 32, 32>}, {pipeline_mode = #tpu.pipeline_mode<synchronous>, transform_indices = @transform_4, window_bounds = array<i64: 1, 32>}, {pipeline_mode = #tpu.pipeline_mode<synchronous>, transform_indices = @transform_5, window_bounds = array<i64: 1, 32>}, {pipeline_mode = #tpu.pipeline_mode<synchronous>, transform_indices = @transform_6, window_bounds = array<i64: 1, 32>}, {transform_indices = @transform_7, window_bounds = array<i64: 1, 8, 32>}]} {
    %c0 = arith.constant 0 : index
    %c0_0 = arith.constant 0 : index
    %c0_1 = arith.constant 0 : index
    %0 = vector.load %arg1[%c0, %c0_0, %c0_1] : memref<1x8x32xbf16, #tpu.memory_space<vmem>>, vector<1x8x32xbf16>
    %1 = vector.shape_cast %0 : vector<1x8x32xbf16> to vector<8x32xbf16>
    %c0_2 = arith.constant 0 : index
    %c0_3 = arith.constant 0 : index
    %2 = vector.load %arg2[%c0_2, %c0_3] : memref<32x96xbf16, #tpu.memory_space<vmem>>, vector<32x96xbf16>
    %cst = arith.constant dense<0.000000e+00> : vector<8x96xf32>
    %3 = tpu.matmul %1, %2, %cst {dimension_numbers = #tpu.dot_dimension_numbers<[1], [0], [0], [1], [0, 0, 1, 1], [], []>} : vector<8x32xbf16>, vector<32x96xbf16>, vector<8x96xf32> -> vector<8x96xf32>
    %c0_4 = arith.constant 0 : index
    %c0_5 = arith.constant 0 : index
    %4 = vector.load %arg3[%c0_4, %c0_5] : memref<1x96xf32, #tpu.memory_space<vmem>>, vector<1x96xf32>
    %5 = vector.broadcast %4 : vector<1x96xf32> to vector<8x96xf32>
    %6 = arith.addf %3, %5 : vector<8x96xf32>
    %7 = vector.extract_strided_slice %6 {offsets = [0, 0], sizes = [8, 32], strides = [1, 1]} : vector<8x96xf32> to vector<8x32xf32>
    %cst_6 = arith.constant 0.353553385 : f32
    %8 = vector.broadcast %cst_6 : f32 to vector<8x32xf32>
    %9 = arith.mulf %7, %8 : vector<8x32xf32>
    %10 = vector.shape_cast %9 : vector<8x32xf32> to vector<1x8x32xf32>
    %11 = vector.extract_strided_slice %6 {offsets = [0, 32], sizes = [8, 32], strides = [1, 1]} : vector<8x96xf32> to vector<8x32xf32>
    %12 = vector.shape_cast %11 : vector<8x32xf32> to vector<1x8x32xf32>
    %13 = vector.extract_strided_slice %6 {offsets = [0, 64], sizes = [8, 32], strides = [1, 1]} : vector<8x96xf32> to vector<8x32xf32>
    %14 = vector.shape_cast %13 : vector<8x32xf32> to vector<1x8x32xf32>
    %c0_7 = arith.constant 0 : index
    %c0_8 = arith.constant 0 : index
    %15 = vector.load %arg4[%c0_7, %c0_8] : memref<32x32xbf16, #tpu.memory_space<vmem>>, vector<32x32xbf16>
    %16 = vector.extract_strided_slice %10 {offsets = [0, 0, 0], sizes = [1, 8, 8], strides = [1, 1, 1]} : vector<1x8x32xf32> to vector<1x8x8xf32>
    %17 = arith.truncf %16 : vector<1x8x8xf32> to vector<1x8x8xbf16>
    %18 = vector.extract_strided_slice %12 {offsets = [0, 0, 0], sizes = [1, 8, 8], strides = [1, 1, 1]} : vector<1x8x32xf32> to vector<1x8x8xf32>
    %19 = arith.truncf %18 : vector<1x8x8xf32> to vector<1x8x8xbf16>
    %20 = vector.extract_strided_slice %14 {offsets = [0, 0, 0], sizes = [1, 8, 8], strides = [1, 1, 1]} : vector<1x8x32xf32> to vector<1x8x8xf32>
    %21 = arith.truncf %20 : vector<1x8x8xf32> to vector<1x8x8xbf16>
    "tpu.trace_start"() <{level = 10 : i32, message = "btd,bsd->bts"}> : () -> ()
    %cst_9 = arith.constant dense<0.000000e+00> : vector<1x8x8xf32>
    %22 = tpu.matmul %17, %19, %cst_9 {dimension_numbers = #tpu.dot_dimension_numbers<[2], [2], [1], [1], [0, 0, 0, 1, 1, 1], [0], [0]>} : vector<1x8x8xbf16>, vector<1x8x8xbf16>, vector<1x8x8xf32> -> vector<1x8x8xf32>
    "tpu.trace_stop"() : () -> ()
    %cst_10 = arith.constant dense<0xFF800000> : vector<1x8xf32>
    %23 = vector.multi_reduction <maximumf>, %22, %cst_10 [2] : vector<1x8x8xf32> to vector<1x8xf32>
    %24 = vector.shape_cast %23 : vector<1x8xf32> to vector<1x8x1xf32>
    %25 = vector.broadcast %24 : vector<1x8x1xf32> to vector<1x8x8xf32>
    %26 = arith.subf %22, %25 : vector<1x8x8xf32>
    %27 = math.exp %26 : vector<1x8x8xf32>
    %cst_11 = arith.constant dense<0.000000e+00> : vector<1x8xf32>
    %28 = vector.multi_reduction <add>, %27, %cst_11 [2] : vector<1x8x8xf32> to vector<1x8xf32>
    %29 = vector.shape_cast %28 : vector<1x8xf32> to vector<1x8x1xf32>
    %30 = vector.broadcast %29 : vector<1x8x1xf32> to vector<1x8x8xf32>
    %31 = arith.divf %27, %30 : vector<1x8x8xf32>
    %32 = arith.truncf %31 : vector<1x8x8xf32> to vector<1x8x8xbf16>
    "tpu.trace_start"() <{level = 10 : i32, message = "bts,bsd->btd"}> : () -> ()
    %cst_12 = arith.constant dense<0.000000e+00> : vector<1x8x8xf32>
    %33 = tpu.matmul %32, %21, %cst_12 {dimension_numbers = #tpu.dot_dimension_numbers<[2], [1], [1], [2], [0, 0, 0, 1, 1, 2], [0], [0]>} : vector<1x8x8xbf16>, vector<1x8x8xbf16>, vector<1x8x8xf32> -> vector<1x8x8xf32>
    "tpu.trace_stop"() : () -> ()
    %34 = vector.extract_strided_slice %10 {offsets = [0, 0, 8], sizes = [1, 8, 8], strides = [1, 1, 1]} : vector<1x8x32xf32> to vector<1x8x8xf32>
    %35 = arith.truncf %34 : vector<1x8x8xf32> to vector<1x8x8xbf16>
    %36 = vector.extract_strided_slice %12 {offsets = [0, 0, 8], sizes = [1, 8, 8], strides = [1, 1, 1]} : vector<1x8x32xf32> to vector<1x8x8xf32>
    %37 = arith.truncf %36 : vector<1x8x8xf32> to vector<1x8x8xbf16>
    %38 = vector.extract_strided_slice %14 {offsets = [0, 0, 8], sizes = [1, 8, 8], strides = [1, 1, 1]} : vector<1x8x32xf32> to vector<1x8x8xf32>
    %39 = arith.truncf %38 : vector<1x8x8xf32> to vector<1x8x8xbf16>
    "tpu.trace_start"() <{level = 10 : i32, message = "btd,bsd->bts"}> : () -> ()
    %cst_13 = arith.constant dense<0.000000e+00> : vector<1x8x8xf32>
    %40 = tpu.matmul %35, %37, %cst_13 {dimension_numbers = #tpu.dot_dimension_numbers<[2], [2], [1], [1], [0, 0, 0, 1, 1, 1], [0], [0]>} : vector<1x8x8xbf16>, vector<1x8x8xbf16>, vector<1x8x8xf32> -> vector<1x8x8xf32>
    "tpu.trace_stop"() : () -> ()
    %cst_14 = arith.constant dense<0xFF800000> : vector<1x8xf32>
    %41 = vector.multi_reduction <maximumf>, %40, %cst_14 [2] : vector<1x8x8xf32> to vector<1x8xf32>
    %42 = vector.shape_cast %41 : vector<1x8xf32> to vector<1x8x1xf32>
    %43 = vector.broadcast %42 : vector<1x8x1xf32> to vector<1x8x8xf32>
    %44 = arith.subf %40, %43 : vector<1x8x8xf32>
    %45 = math.exp %44 : vector<1x8x8xf32>
    %cst_15 = arith.constant dense<0.000000e+00> : vector<1x8xf32>
    %46 = vector.multi_reduction <add>, %45, %cst_15 [2] : vector<1x8x8xf32> to vector<1x8xf32>
    %47 = vector.shape_cast %46 : vector<1x8xf32> to vector<1x8x1xf32>
    %48 = vector.broadcast %47 : vector<1x8x1xf32> to vector<1x8x8xf32>
    %49 = arith.divf %45, %48 : vector<1x8x8xf32>
    %50 = arith.truncf %49 : vector<1x8x8xf32> to vector<1x8x8xbf16>
    "tpu.trace_start"() <{level = 10 : i32, message = "bts,bsd->btd"}> : () -> ()
    %cst_16 = arith.constant dense<0.000000e+00> : vector<1x8x8xf32>
    %51 = tpu.matmul %50, %39, %cst_16 {dimension_numbers = #tpu.dot_dimension_numbers<[2], [1], [1], [2], [0, 0, 0, 1, 1, 2], [0], [0]>} : vector<1x8x8xbf16>, vector<1x8x8xbf16>, vector<1x8x8xf32> -> vector<1x8x8xf32>
    "tpu.trace_stop"() : () -> ()
    %52 = vector.extract_strided_slice %10 {offsets = [0, 0, 16], sizes = [1, 8, 8], strides = [1, 1, 1]} : vector<1x8x32xf32> to vector<1x8x8xf32>
    %53 = arith.truncf %52 : vector<1x8x8xf32> to vector<1x8x8xbf16>
    %54 = vector.extract_strided_slice %12 {offsets = [0, 0, 16], sizes = [1, 8, 8], strides = [1, 1, 1]} : vector<1x8x32xf32> to vector<1x8x8xf32>
    %55 = arith.truncf %54 : vector<1x8x8xf32> to vector<1x8x8xbf16>
    %56 = vector.extract_strided_slice %14 {offsets = [0, 0, 16], sizes = [1, 8, 8], strides = [1, 1, 1]} : vector<1x8x32xf32> to vector<1x8x8xf32>
    %57 = arith.truncf %56 : vector<1x8x8xf32> to vector<1x8x8xbf16>
    "tpu.trace_start"() <{level = 10 : i32, message = "btd,bsd->bts"}> : () -> ()
    %cst_17 = arith.constant dense<0.000000e+00> : vector<1x8x8xf32>
    %58 = tpu.matmul %53, %55, %cst_17 {dimension_numbers = #tpu.dot_dimension_numbers<[2], [2], [1], [1], [0, 0, 0, 1, 1, 1], [0], [0]>} : vector<1x8x8xbf16>, vector<1x8x8xbf16>, vector<1x8x8xf32> -> vector<1x8x8xf32>
    "tpu.trace_stop"() : () -> ()
    %cst_18 = arith.constant dense<0xFF800000> : vector<1x8xf32>
    %59 = vector.multi_reduction <maximumf>, %58, %cst_18 [2] : vector<1x8x8xf32> to vector<1x8xf32>
    %60 = vector.shape_cast %59 : vector<1x8xf32> to vector<1x8x1xf32>
    %61 = vector.broadcast %60 : vector<1x8x1xf32> to vector<1x8x8xf32>
    %62 = arith.subf %58, %61 : vector<1x8x8xf32>
    %63 = math.exp %62 : vector<1x8x8xf32>
    %cst_19 = arith.constant dense<0.000000e+00> : vector<1x8xf32>
    %64 = vector.multi_reduction <add>, %63, %cst_19 [2] : vector<1x8x8xf32> to vector<1x8xf32>
    %65 = vector.shape_cast %64 : vector<1x8xf32> to vector<1x8x1xf32>
    %66 = vector.broadcast %65 : vector<1x8x1xf32> to vector<1x8x8xf32>
    %67 = arith.divf %63, %66 : vector<1x8x8xf32>
    %68 = arith.truncf %67 : vector<1x8x8xf32> to vector<1x8x8xbf16>
    "tpu.trace_start"() <{level = 10 : i32, message = "bts,bsd->btd"}> : () -> ()
    %cst_20 = arith.constant dense<0.000000e+00> : vector<1x8x8xf32>
    %69 = tpu.matmul %68, %57, %cst_20 {dimension_numbers = #tpu.dot_dimension_numbers<[2], [1], [1], [2], [0, 0, 0, 1, 1, 2], [0], [0]>} : vector<1x8x8xbf16>, vector<1x8x8xbf16>, vector<1x8x8xf32> -> vector<1x8x8xf32>
    "tpu.trace_stop"() : () -> ()
    %70 = vector.extract_strided_slice %10 {offsets = [0, 0, 24], sizes = [1, 8, 8], strides = [1, 1, 1]} : vector<1x8x32xf32> to vector<1x8x8xf32>
    %71 = arith.truncf %70 : vector<1x8x8xf32> to vector<1x8x8xbf16>
    %72 = vector.extract_strided_slice %12 {offsets = [0, 0, 24], sizes = [1, 8, 8], strides = [1, 1, 1]} : vector<1x8x32xf32> to vector<1x8x8xf32>
    %73 = arith.truncf %72 : vector<1x8x8xf32> to vector<1x8x8xbf16>
    %74 = vector.extract_strided_slice %14 {offsets = [0, 0, 24], sizes = [1, 8, 8], strides = [1, 1, 1]} : vector<1x8x32xf32> to vector<1x8x8xf32>
    %75 = arith.truncf %74 : vector<1x8x8xf32> to vector<1x8x8xbf16>
    "tpu.trace_start"() <{level = 10 : i32, message = "btd,bsd->bts"}> : () -> ()
    %cst_21 = arith.constant dense<0.000000e+00> : vector<1x8x8xf32>
    %76 = tpu.matmul %71, %73, %cst_21 {dimension_numbers = #tpu.dot_dimension_numbers<[2], [2], [1], [1], [0, 0, 0, 1, 1, 1], [0], [0]>} : vector<1x8x8xbf16>, vector<1x8x8xbf16>, vector<1x8x8xf32> -> vector<1x8x8xf32>
    "tpu.trace_stop"() : () -> ()
    %cst_22 = arith.constant dense<0xFF800000> : vector<1x8xf32>
    %77 = vector.multi_reduction <maximumf>, %76, %cst_22 [2] : vector<1x8x8xf32> to vector<1x8xf32>
    %78 = vector.shape_cast %77 : vector<1x8xf32> to vector<1x8x1xf32>
    %79 = vector.broadcast %78 : vector<1x8x1xf32> to vector<1x8x8xf32>
    %80 = arith.subf %76, %79 : vector<1x8x8xf32>
    %81 = math.exp %80 : vector<1x8x8xf32>
    %cst_23 = arith.constant dense<0.000000e+00> : vector<1x8xf32>
    %82 = vector.multi_reduction <add>, %81, %cst_23 [2] : vector<1x8x8xf32> to vector<1x8xf32>
    %83 = vector.shape_cast %82 : vector<1x8xf32> to vector<1x8x1xf32>
    %84 = vector.broadcast %83 : vector<1x8x1xf32> to vector<1x8x8xf32>
    %85 = arith.divf %81, %84 : vector<1x8x8xf32>
    %86 = arith.truncf %85 : vector<1x8x8xf32> to vector<1x8x8xbf16>
    "tpu.trace_start"() <{level = 10 : i32, message = "bts,bsd->btd"}> : () -> ()
    %cst_24 = arith.constant dense<0.000000e+00> : vector<1x8x8xf32>
    %87 = tpu.matmul %86, %75, %cst_24 {dimension_numbers = #tpu.dot_dimension_numbers<[2], [1], [1], [2], [0, 0, 0, 1, 1, 2], [0], [0]>} : vector<1x8x8xbf16>, vector<1x8x8xbf16>, vector<1x8x8xf32> -> vector<1x8x8xf32>
    "tpu.trace_stop"() : () -> ()
    %88 = tpu.concatenate %33, %51, %69, %87 in 2 : vector<1x8x8xf32>, vector<1x8x8xf32>, vector<1x8x8xf32>, vector<1x8x8xf32> -> vector<1x8x32xf32>
    %89 = vector.shape_cast %88 : vector<1x8x32xf32> to vector<8x32xf32>
    %90 = arith.truncf %89 : vector<8x32xf32> to vector<8x32xbf16>
    %cst_25 = arith.constant dense<0.000000e+00> : vector<8x32xf32>
    %91 = tpu.matmul %90, %15, %cst_25 {dimension_numbers = #tpu.dot_dimension_numbers<[1], [0], [0], [1], [0, 0, 1, 1], [], []>} : vector<8x32xbf16>, vector<32x32xbf16>, vector<8x32xf32> -> vector<8x32xf32>
    %c0_26 = arith.constant 0 : index
    %c0_27 = arith.constant 0 : index
    %92 = vector.load %arg5[%c0_26, %c0_27] : memref<1x32xf32, #tpu.memory_space<vmem>>, vector<1x32xf32>
    %93 = vector.broadcast %92 : vector<1x32xf32> to vector<8x32xf32>
    %94 = arith.addf %91, %93 : vector<8x32xf32>
    %95 = arith.extf %1 : vector<8x32xbf16> to vector<8x32xf32>
    %96 = arith.addf %95, %94 : vector<8x32xf32>
    %c0_28 = arith.constant 0 : index
    %c0_29 = arith.constant 0 : index
    %97 = vector.load %arg6[%c0_28, %c0_29] : memref<1x32xf32, #tpu.memory_space<vmem>>, vector<1x32xf32>
    %c0_30 = arith.constant 0 : index
    %c0_31 = arith.constant 0 : index
    %98 = vector.load %arg7[%c0_30, %c0_31] : memref<1x32xf32, #tpu.memory_space<vmem>>, vector<1x32xf32>
    %cst_32 = arith.constant dense<0.000000e+00> : vector<8xf32>
    %99 = vector.multi_reduction <add>, %96, %cst_32 [1] : vector<8x32xf32> to vector<8xf32>
    %100 = vector.shape_cast %99 : vector<8xf32> to vector<8x1xf32>
    %cst_33 = arith.constant 3.200000e+01 : f32
    %101 = vector.broadcast %cst_33 : f32 to vector<8x1xf32>
    %102 = arith.divf %100, %101 : vector<8x1xf32>
    %103 = vector.broadcast %102 : vector<8x1xf32> to vector<8x32xf32>
    %104 = arith.subf %96, %103 : vector<8x32xf32>
    %105 = arith.mulf %104, %104 : vector<8x32xf32>
    %cst_34 = arith.constant dense<0.000000e+00> : vector<8xf32>
    %106 = vector.multi_reduction <add>, %105, %cst_34 [1] : vector<8x32xf32> to vector<8xf32>
    %107 = vector.shape_cast %106 : vector<8xf32> to vector<8x1xf32>
    %cst_35 = arith.constant 3.200000e+01 : f32
    %108 = vector.broadcast %cst_35 : f32 to vector<8x1xf32>
    %109 = arith.divf %107, %108 : vector<8x1xf32>
    %cst_36 = arith.constant 9.99999974E-6 : f32
    %110 = vector.broadcast %cst_36 : f32 to vector<8x1xf32>
    %111 = arith.addf %109, %110 : vector<8x1xf32>
    %112 = math.rsqrt %111 : vector<8x1xf32>
    %113 = vector.broadcast %112 : vector<8x1xf32> to vector<8x32xf32>
    %114 = arith.mulf %104, %113 : vector<8x32xf32>
    %115 = vector.broadcast %97 : vector<1x32xf32> to vector<8x32xf32>
    %116 = arith.mulf %114, %115 : vector<8x32xf32>
    %117 = vector.broadcast %98 : vector<1x32xf32> to vector<8x32xf32>
    %118 = arith.addf %116, %117 : vector<8x32xf32>
    %119 = vector.shape_cast %118 : vector<8x32xf32> to vector<1x8x32xf32>
    %120 = arith.truncf %119 : vector<1x8x32xf32> to vector<1x8x32xbf16>
    %c0_37 = arith.constant 0 : index
    %c0_38 = arith.constant 0 : index
    %c0_39 = arith.constant 0 : index
    %121 = vector.load %arg8[%c0_37, %c0_38, %c0_39] : memref<1x8x32xbf16, #tpu.memory_space<vmem>>, vector<1x8x32xbf16>
    tpu.vector_store %arg8[%c0_37, %c0_38, %c0_39], %120 {strides = array<i32>} : memref<1x8x32xbf16, #tpu.memory_space<vmem>>, vector<1x8x32xbf16>,
    return
  }
  func.func @transform_0(%arg0: i32) -> (i32, i32, i32) {
    %c0_i32 = arith.constant 0 : i32
    %c0_i32_0 = arith.constant 0 : i32
    %c0_i32_1 = arith.constant 0 : i32
    return %arg0, %c0_i32, %c0_i32_0 : i32, i32, i32
  }
  func.func @transform_1(%arg0: i32) -> (i32, i32) {
    %c0_i32 = arith.constant 0 : i32
    %c0_i32_0 = arith.constant 0 : i32
    %c0_i32_1 = arith.constant 0 : i32
    return %c0_i32, %c0_i32_0 : i32, i32
  }
  func.func @transform_2(%arg0: i32) -> (i32, i32) {
    %c0_i32 = arith.constant 0 : i32
    %c0_i32_0 = arith.constant 0 : i32
    %c0_i32_1 = arith.constant 0 : i32
    return %c0_i32, %c0_i32_0 : i32, i32
  }
  func.func @transform_3(%arg0: i32) -> (i32, i32) {
    %c0_i32 = arith.constant 0 : i32
    %c0_i32_0 = arith.constant 0 : i32
    %c0_i32_1 = arith.constant 0 : i32
    return %c0_i32, %c0_i32_0 : i32, i32
  }
  func.func @transform_4(%arg0: i32) -> (i32, i32) {
    %c0_i32 = arith.constant 0 : i32
    %c0_i32_0 = arith.constant 0 : i32
    %c0_i32_1 = arith.constant 0 : i32
    return %c0_i32, %c0_i32_0 : i32, i32
  }
  func.func @transform_5(%arg0: i32) -> (i32, i32) {
    %c0_i32 = arith.constant 0 : i32
    %c0_i32_0 = arith.constant 0 : i32
    %c0_i32_1 = arith.constant 0 : i32
    return %c0_i32, %c0_i32_0 : i32, i32
  }
  func.func @transform_6(%arg0: i32) -> (i32, i32) {
    %c0_i32 = arith.constant 0 : i32
    %c0_i32_0 = arith.constant 0 : i32
    %c0_i32_1 = arith.constant 0 : i32
    return %c0_i32, %c0_i32_0 : i32, i32
  }
  func.func @transform_7(%arg0: i32) -> (i32, i32, i32) {
    %c0_i32 = arith.constant 0 : i32
    %c0_i32_0 = arith.constant 0 : i32
    %c0_i32_1 = arith.constant 0 : i32
    return %arg0, %c0_i32, %c0_i32_0 : i32, i32, i32
  }
}

module attributes {stable_mosaic.version = 11 : i64} {
  func.func @_ln_kernel(%arg0: i32, %arg1: memref<8x32xbf16, #tpu.memory_space<vmem>>, %arg2: memref<1x32xf32, #tpu.memory_space<vmem>>, %arg3: memref<1x32xf32, #tpu.memory_space<vmem>>, %arg4: memref<8x32xbf16, #tpu.memory_space<vmem>>) attributes {dimension_semantics = [#tpu.dimension_semantics<parallel>], iteration_bounds = array<i64: 2>, scalar_prefetch = 0 : i64, scratch_operands = 0 : i64, tpu.core_type = #tpu.core_type<tc>, window_params = [{transform_indices = @transform_0, window_bounds = array<i64: 8, 32>}, {pipeline_mode = #tpu.pipeline_mode<synchronous>, transform_indices = @transform_1, window_bounds = array<i64: 1, 32>}, {pipeline_mode = #tpu.pipeline_mode<synchronous>, transform_indices = @transform_2, window_bounds = array<i64: 1, 32>}, {transform_indices = @transform_3, window_bounds = array<i64: 8, 32>}]} {
    %c0 = arith.constant 0 : index
    %c0_0 = arith.constant 0 : index
    %0 = vector.load %arg1[%c0, %c0_0] : memref<8x32xbf16, #tpu.memory_space<vmem>>, vector<8x32xbf16>
    %1 = arith.extf %0 : vector<8x32xbf16> to vector<8x32xf32>
    %c0_1 = arith.constant 0 : index
    %c0_2 = arith.constant 0 : index
    %2 = vector.load %arg2[%c0_1, %c0_2] : memref<1x32xf32, #tpu.memory_space<vmem>>, vector<1x32xf32>
    %c0_3 = arith.constant 0 : index
    %c0_4 = arith.constant 0 : index
    %3 = vector.load %arg3[%c0_3, %c0_4] : memref<1x32xf32, #tpu.memory_space<vmem>>, vector<1x32xf32>
    %cst = arith.constant dense<0.000000e+00> : vector<8xf32>
    %4 = vector.multi_reduction <add>, %1, %cst [1] : vector<8x32xf32> to vector<8xf32>
    %5 = vector.shape_cast %4 : vector<8xf32> to vector<8x1xf32>
    %cst_5 = arith.constant 3.200000e+01 : f32
    %6 = vector.broadcast %cst_5 : f32 to vector<8x1xf32>
    %7 = arith.divf %5, %6 : vector<8x1xf32>
    %8 = vector.broadcast %7 : vector<8x1xf32> to vector<8x32xf32>
    %9 = arith.subf %1, %8 : vector<8x32xf32>
    %10 = arith.mulf %9, %9 : vector<8x32xf32>
    %cst_6 = arith.constant dense<0.000000e+00> : vector<8xf32>
    %11 = vector.multi_reduction <add>, %10, %cst_6 [1] : vector<8x32xf32> to vector<8xf32>
    %12 = vector.shape_cast %11 : vector<8xf32> to vector<8x1xf32>
    %cst_7 = arith.constant 3.200000e+01 : f32
    %13 = vector.broadcast %cst_7 : f32 to vector<8x1xf32>
    %14 = arith.divf %12, %13 : vector<8x1xf32>
    %cst_8 = arith.constant 9.99999974E-6 : f32
    %15 = vector.broadcast %cst_8 : f32 to vector<8x1xf32>
    %16 = arith.addf %14, %15 : vector<8x1xf32>
    %17 = math.rsqrt %16 : vector<8x1xf32>
    %18 = vector.broadcast %17 : vector<8x1xf32> to vector<8x32xf32>
    %19 = arith.mulf %9, %18 : vector<8x32xf32>
    %20 = vector.broadcast %2 : vector<1x32xf32> to vector<8x32xf32>
    %21 = arith.mulf %19, %20 : vector<8x32xf32>
    %22 = vector.broadcast %3 : vector<1x32xf32> to vector<8x32xf32>
    %23 = arith.addf %21, %22 : vector<8x32xf32>
    %24 = arith.truncf %23 : vector<8x32xf32> to vector<8x32xbf16>
    %c0_9 = arith.constant 0 : index
    %c0_10 = arith.constant 0 : index
    %25 = vector.load %arg4[%c0_9, %c0_10] : memref<8x32xbf16, #tpu.memory_space<vmem>>, vector<8x32xbf16>
    tpu.vector_store %arg4[%c0_9, %c0_10], %24 {strides = array<i32>} : memref<8x32xbf16, #tpu.memory_space<vmem>>, vector<8x32xbf16>,
    return
  }
  func.func @transform_0(%arg0: i32) -> (i32, i32) {
    %c0_i32 = arith.constant 0 : i32
    %c0_i32_0 = arith.constant 0 : i32
    return %arg0, %c0_i32 : i32, i32
  }
  func.func @transform_1(%arg0: i32) -> (i32, i32) {
    %c0_i32 = arith.constant 0 : i32
    %c0_i32_0 = arith.constant 0 : i32
    %c0_i32_1 = arith.constant 0 : i32
    return %c0_i32, %c0_i32_0 : i32, i32
  }
  func.func @transform_2(%arg0: i32) -> (i32, i32) {
    %c0_i32 = arith.constant 0 : i32
    %c0_i32_0 = arith.constant 0 : i32
    %c0_i32_1 = arith.constant 0 : i32
    return %c0_i32, %c0_i32_0 : i32, i32
  }
  func.func @transform_3(%arg0: i32) -> (i32, i32) {
    %c0_i32 = arith.constant 0 : i32
    %c0_i32_0 = arith.constant 0 : i32
    return %arg0, %c0_i32 : i32, i32
  }
}

module attributes {stable_mosaic.version = 11 : i64} {
  func.func @_cross_mha_ln_kernel(%arg0: i32, %arg1: memref<1x8x32xbf16, #tpu.memory_space<vmem>>, %arg2: memref<1x8x32xbf16, #tpu.memory_space<vmem>>, %arg3: memref<32x32xbf16, #tpu.memory_space<vmem>>, %arg4: memref<1x32xf32, #tpu.memory_space<vmem>>, %arg5: memref<32x64xbf16, #tpu.memory_space<vmem>>, %arg6: memref<1x64xf32, #tpu.memory_space<vmem>>, %arg7: memref<32x32xbf16, #tpu.memory_space<vmem>>, %arg8: memref<1x32xf32, #tpu.memory_space<vmem>>, %arg9: memref<1x32xf32, #tpu.memory_space<vmem>>, %arg10: memref<1x32xf32, #tpu.memory_space<vmem>>, %arg11: memref<1x8x32xbf16, #tpu.memory_space<vmem>>) attributes {dimension_semantics = [#tpu.dimension_semantics<parallel>], iteration_bounds = array<i64: 2>, scalar_prefetch = 0 : i64, scratch_operands = 0 : i64, tpu.core_type = #tpu.core_type<tc>, window_params = [{transform_indices = @transform_0, window_bounds = array<i64: 1, 8, 32>}, {transform_indices = @transform_1, window_bounds = array<i64: 1, 8, 32>}, {pipeline_mode = #tpu.pipeline_mode<synchronous>, transform_indices = @transform_2, window_bounds = array<i64: 32, 32>}, {pipeline_mode = #tpu.pipeline_mode<synchronous>, transform_indices = @transform_3, window_bounds = array<i64: 1, 32>}, {pipeline_mode = #tpu.pipeline_mode<synchronous>, transform_indices = @transform_4, window_bounds = array<i64: 32, 64>}, {pipeline_mode = #tpu.pipeline_mode<synchronous>, transform_indices = @transform_5, window_bounds = array<i64: 1, 64>}, {pipeline_mode = #tpu.pipeline_mode<synchronous>, transform_indices = @transform_6, window_bounds = array<i64: 32, 32>}, {pipeline_mode = #tpu.pipeline_mode<synchronous>, transform_indices = @transform_7, window_bounds = array<i64: 1, 32>}, {pipeline_mode = #tpu.pipeline_mode<synchronous>, transform_indices = @transform_8, window_bounds = array<i64: 1, 32>}, {pipeline_mode = #tpu.pipeline_mode<synchronous>, transform_indices = @transform_9, window_bounds = array<i64: 1, 32>}, {transform_indices = @transform_10, window_bounds = array<i64: 1, 8, 32>}]} {
    %c0 = arith.constant 0 : index
    %c0_0 = arith.constant 0 : index
    %c0_1 = arith.constant 0 : index
    %0 = vector.load %arg1[%c0, %c0_0, %c0_1] : memref<1x8x32xbf16, #tpu.memory_space<vmem>>, vector<1x8x32xbf16>
    %1 = vector.shape_cast %0 : vector<1x8x32xbf16> to vector<8x32xbf16>
    %c0_2 = arith.constant 0 : index
    %c0_3 = arith.constant 0 : index
    %c0_4 = arith.constant 0 : index
    %2 = vector.load %arg2[%c0_2, %c0_3, %c0_4] : memref<1x8x32xbf16, #tpu.memory_space<vmem>>, vector<1x8x32xbf16>
    %3 = vector.shape_cast %2 : vector<1x8x32xbf16> to vector<8x32xbf16>
    %c0_5 = arith.constant 0 : index
    %c0_6 = arith.constant 0 : index
    %4 = vector.load %arg3[%c0_5, %c0_6] : memref<32x32xbf16, #tpu.memory_space<vmem>>, vector<32x32xbf16>
    %cst = arith.constant dense<0.000000e+00> : vector<8x32xf32>
    %5 = tpu.matmul %1, %4, %cst {dimension_numbers = #tpu.dot_dimension_numbers<[1], [0], [0], [1], [0, 0, 1, 1], [], []>} : vector<8x32xbf16>, vector<32x32xbf16>, vector<8x32xf32> -> vector<8x32xf32>
    %c0_7 = arith.constant 0 : index
    %c0_8 = arith.constant 0 : index
    %6 = vector.load %arg4[%c0_7, %c0_8] : memref<1x32xf32, #tpu.memory_space<vmem>>, vector<1x32xf32>
    %7 = vector.broadcast %6 : vector<1x32xf32> to vector<8x32xf32>
    %8 = arith.addf %5, %7 : vector<8x32xf32>
    %cst_9 = arith.constant 0.353553385 : f32
    %9 = vector.broadcast %cst_9 : f32 to vector<8x32xf32>
    %10 = arith.mulf %8, %9 : vector<8x32xf32>
    %c0_10 = arith.constant 0 : index
    %c0_11 = arith.constant 0 : index
    %11 = vector.load %arg5[%c0_10, %c0_11] : memref<32x64xbf16, #tpu.memory_space<vmem>>, vector<32x64xbf16>
    %cst_12 = arith.constant dense<0.000000e+00> : vector<8x64xf32>
    %12 = tpu.matmul %3, %11, %cst_12 {dimension_numbers = #tpu.dot_dimension_numbers<[1], [0], [0], [1], [0, 0, 1, 1], [], []>} : vector<8x32xbf16>, vector<32x64xbf16>, vector<8x64xf32> -> vector<8x64xf32>
    %c0_13 = arith.constant 0 : index
    %c0_14 = arith.constant 0 : index
    %13 = vector.load %arg6[%c0_13, %c0_14] : memref<1x64xf32, #tpu.memory_space<vmem>>, vector<1x64xf32>
    %14 = vector.broadcast %13 : vector<1x64xf32> to vector<8x64xf32>
    %15 = arith.addf %12, %14 : vector<8x64xf32>
    %16 = vector.shape_cast %10 : vector<8x32xf32> to vector<1x8x32xf32>
    %17 = vector.extract_strided_slice %15 {offsets = [0, 0], sizes = [8, 32], strides = [1, 1]} : vector<8x64xf32> to vector<8x32xf32>
    %18 = vector.shape_cast %17 : vector<8x32xf32> to vector<1x8x32xf32>
    %19 = vector.extract_strided_slice %15 {offsets = [0, 32], sizes = [8, 32], strides = [1, 1]} : vector<8x64xf32> to vector<8x32xf32>
    %20 = vector.shape_cast %19 : vector<8x32xf32> to vector<1x8x32xf32>
    %c0_15 = arith.constant 0 : index
    %c0_16 = arith.constant 0 : index
    %21 = vector.load %arg7[%c0_15, %c0_16] : memref<32x32xbf16, #tpu.memory_space<vmem>>, vector<32x32xbf16>
    %22 = vector.extract_strided_slice %16 {offsets = [0, 0, 0], sizes = [1, 8, 8], strides = [1, 1, 1]} : vector<1x8x32xf32> to vector<1x8x8xf32>
    %23 = arith.truncf %22 : vector<1x8x8xf32> to vector<1x8x8xbf16>
    %24 = vector.extract_strided_slice %18 {offsets = [0, 0, 0], sizes = [1, 8, 8], strides = [1, 1, 1]} : vector<1x8x32xf32> to vector<1x8x8xf32>
    %25 = arith.truncf %24 : vector<1x8x8xf32> to vector<1x8x8xbf16>
    %26 = vector.extract_strided_slice %20 {offsets = [0, 0, 0], sizes = [1, 8, 8], strides = [1, 1, 1]} : vector<1x8x32xf32> to vector<1x8x8xf32>
    %27 = arith.truncf %26 : vector<1x8x8xf32> to vector<1x8x8xbf16>
    "tpu.trace_start"() <{level = 10 : i32, message = "btd,bsd->bts"}> : () -> ()
    %cst_17 = arith.constant dense<0.000000e+00> : vector<1x8x8xf32>
    %28 = tpu.matmul %23, %25, %cst_17 {dimension_numbers = #tpu.dot_dimension_numbers<[2], [2], [1], [1], [0, 0, 0, 1, 1, 1], [0], [0]>} : vector<1x8x8xbf16>, vector<1x8x8xbf16>, vector<1x8x8xf32> -> vector<1x8x8xf32>
    "tpu.trace_stop"() : () -> ()
    %cst_18 = arith.constant dense<0xFF800000> : vector<1x8xf32>
    %29 = vector.multi_reduction <maximumf>, %28, %cst_18 [2] : vector<1x8x8xf32> to vector<1x8xf32>
    %30 = vector.shape_cast %29 : vector<1x8xf32> to vector<1x8x1xf32>
    %31 = vector.broadcast %30 : vector<1x8x1xf32> to vector<1x8x8xf32>
    %32 = arith.subf %28, %31 : vector<1x8x8xf32>
    %33 = math.exp %32 : vector<1x8x8xf32>
    %cst_19 = arith.constant dense<0.000000e+00> : vector<1x8xf32>
    %34 = vector.multi_reduction <add>, %33, %cst_19 [2] : vector<1x8x8xf32> to vector<1x8xf32>
    %35 = vector.shape_cast %34 : vector<1x8xf32> to vector<1x8x1xf32>
    %36 = vector.broadcast %35 : vector<1x8x1xf32> to vector<1x8x8xf32>
    %37 = arith.divf %33, %36 : vector<1x8x8xf32>
    %38 = arith.truncf %37 : vector<1x8x8xf32> to vector<1x8x8xbf16>
    "tpu.trace_start"() <{level = 10 : i32, message = "bts,bsd->btd"}> : () -> ()
    %cst_20 = arith.constant dense<0.000000e+00> : vector<1x8x8xf32>
    %39 = tpu.matmul %38, %27, %cst_20 {dimension_numbers = #tpu.dot_dimension_numbers<[2], [1], [1], [2], [0, 0, 0, 1, 1, 2], [0], [0]>} : vector<1x8x8xbf16>, vector<1x8x8xbf16>, vector<1x8x8xf32> -> vector<1x8x8xf32>
    "tpu.trace_stop"() : () -> ()
    %40 = vector.extract_strided_slice %16 {offsets = [0, 0, 8], sizes = [1, 8, 8], strides = [1, 1, 1]} : vector<1x8x32xf32> to vector<1x8x8xf32>
    %41 = arith.truncf %40 : vector<1x8x8xf32> to vector<1x8x8xbf16>
    %42 = vector.extract_strided_slice %18 {offsets = [0, 0, 8], sizes = [1, 8, 8], strides = [1, 1, 1]} : vector<1x8x32xf32> to vector<1x8x8xf32>
    %43 = arith.truncf %42 : vector<1x8x8xf32> to vector<1x8x8xbf16>
    %44 = vector.extract_strided_slice %20 {offsets = [0, 0, 8], sizes = [1, 8, 8], strides = [1, 1, 1]} : vector<1x8x32xf32> to vector<1x8x8xf32>
    %45 = arith.truncf %44 : vector<1x8x8xf32> to vector<1x8x8xbf16>
    "tpu.trace_start"() <{level = 10 : i32, message = "btd,bsd->bts"}> : () -> ()
    %cst_21 = arith.constant dense<0.000000e+00> : vector<1x8x8xf32>
    %46 = tpu.matmul %41, %43, %cst_21 {dimension_numbers = #tpu.dot_dimension_numbers<[2], [2], [1], [1], [0, 0, 0, 1, 1, 1], [0], [0]>} : vector<1x8x8xbf16>, vector<1x8x8xbf16>, vector<1x8x8xf32> -> vector<1x8x8xf32>
    "tpu.trace_stop"() : () -> ()
    %cst_22 = arith.constant dense<0xFF800000> : vector<1x8xf32>
    %47 = vector.multi_reduction <maximumf>, %46, %cst_22 [2] : vector<1x8x8xf32> to vector<1x8xf32>
    %48 = vector.shape_cast %47 : vector<1x8xf32> to vector<1x8x1xf32>
    %49 = vector.broadcast %48 : vector<1x8x1xf32> to vector<1x8x8xf32>
    %50 = arith.subf %46, %49 : vector<1x8x8xf32>
    %51 = math.exp %50 : vector<1x8x8xf32>
    %cst_23 = arith.constant dense<0.000000e+00> : vector<1x8xf32>
    %52 = vector.multi_reduction <add>, %51, %cst_23 [2] : vector<1x8x8xf32> to vector<1x8xf32>
    %53 = vector.shape_cast %52 : vector<1x8xf32> to vector<1x8x1xf32>
    %54 = vector.broadcast %53 : vector<1x8x1xf32> to vector<1x8x8xf32>
    %55 = arith.divf %51, %54 : vector<1x8x8xf32>
    %56 = arith.truncf %55 : vector<1x8x8xf32> to vector<1x8x8xbf16>
    "tpu.trace_start"() <{level = 10 : i32, message = "bts,bsd->btd"}> : () -> ()
    %cst_24 = arith.constant dense<0.000000e+00> : vector<1x8x8xf32>
    %57 = tpu.matmul %56, %45, %cst_24 {dimension_numbers = #tpu.dot_dimension_numbers<[2], [1], [1], [2], [0, 0, 0, 1, 1, 2], [0], [0]>} : vector<1x8x8xbf16>, vector<1x8x8xbf16>, vector<1x8x8xf32> -> vector<1x8x8xf32>
    "tpu.trace_stop"() : () -> ()
    %58 = vector.extract_strided_slice %16 {offsets = [0, 0, 16], sizes = [1, 8, 8], strides = [1, 1, 1]} : vector<1x8x32xf32> to vector<1x8x8xf32>
    %59 = arith.truncf %58 : vector<1x8x8xf32> to vector<1x8x8xbf16>
    %60 = vector.extract_strided_slice %18 {offsets = [0, 0, 16], sizes = [1, 8, 8], strides = [1, 1, 1]} : vector<1x8x32xf32> to vector<1x8x8xf32>
    %61 = arith.truncf %60 : vector<1x8x8xf32> to vector<1x8x8xbf16>
    %62 = vector.extract_strided_slice %20 {offsets = [0, 0, 16], sizes = [1, 8, 8], strides = [1, 1, 1]} : vector<1x8x32xf32> to vector<1x8x8xf32>
    %63 = arith.truncf %62 : vector<1x8x8xf32> to vector<1x8x8xbf16>
    "tpu.trace_start"() <{level = 10 : i32, message = "btd,bsd->bts"}> : () -> ()
    %cst_25 = arith.constant dense<0.000000e+00> : vector<1x8x8xf32>
    %64 = tpu.matmul %59, %61, %cst_25 {dimension_numbers = #tpu.dot_dimension_numbers<[2], [2], [1], [1], [0, 0, 0, 1, 1, 1], [0], [0]>} : vector<1x8x8xbf16>, vector<1x8x8xbf16>, vector<1x8x8xf32> -> vector<1x8x8xf32>
    "tpu.trace_stop"() : () -> ()
    %cst_26 = arith.constant dense<0xFF800000> : vector<1x8xf32>
    %65 = vector.multi_reduction <maximumf>, %64, %cst_26 [2] : vector<1x8x8xf32> to vector<1x8xf32>
    %66 = vector.shape_cast %65 : vector<1x8xf32> to vector<1x8x1xf32>
    %67 = vector.broadcast %66 : vector<1x8x1xf32> to vector<1x8x8xf32>
    %68 = arith.subf %64, %67 : vector<1x8x8xf32>
    %69 = math.exp %68 : vector<1x8x8xf32>
    %cst_27 = arith.constant dense<0.000000e+00> : vector<1x8xf32>
    %70 = vector.multi_reduction <add>, %69, %cst_27 [2] : vector<1x8x8xf32> to vector<1x8xf32>
    %71 = vector.shape_cast %70 : vector<1x8xf32> to vector<1x8x1xf32>
    %72 = vector.broadcast %71 : vector<1x8x1xf32> to vector<1x8x8xf32>
    %73 = arith.divf %69, %72 : vector<1x8x8xf32>
    %74 = arith.truncf %73 : vector<1x8x8xf32> to vector<1x8x8xbf16>
    "tpu.trace_start"() <{level = 10 : i32, message = "bts,bsd->btd"}> : () -> ()
    %cst_28 = arith.constant dense<0.000000e+00> : vector<1x8x8xf32>
    %75 = tpu.matmul %74, %63, %cst_28 {dimension_numbers = #tpu.dot_dimension_numbers<[2], [1], [1], [2], [0, 0, 0, 1, 1, 2], [0], [0]>} : vector<1x8x8xbf16>, vector<1x8x8xbf16>, vector<1x8x8xf32> -> vector<1x8x8xf32>
    "tpu.trace_stop"() : () -> ()
    %76 = vector.extract_strided_slice %16 {offsets = [0, 0, 24], sizes = [1, 8, 8], strides = [1, 1, 1]} : vector<1x8x32xf32> to vector<1x8x8xf32>
    %77 = arith.truncf %76 : vector<1x8x8xf32> to vector<1x8x8xbf16>
    %78 = vector.extract_strided_slice %18 {offsets = [0, 0, 24], sizes = [1, 8, 8], strides = [1, 1, 1]} : vector<1x8x32xf32> to vector<1x8x8xf32>
    %79 = arith.truncf %78 : vector<1x8x8xf32> to vector<1x8x8xbf16>
    %80 = vector.extract_strided_slice %20 {offsets = [0, 0, 24], sizes = [1, 8, 8], strides = [1, 1, 1]} : vector<1x8x32xf32> to vector<1x8x8xf32>
    %81 = arith.truncf %80 : vector<1x8x8xf32> to vector<1x8x8xbf16>
    "tpu.trace_start"() <{level = 10 : i32, message = "btd,bsd->bts"}> : () -> ()
    %cst_29 = arith.constant dense<0.000000e+00> : vector<1x8x8xf32>
    %82 = tpu.matmul %77, %79, %cst_29 {dimension_numbers = #tpu.dot_dimension_numbers<[2], [2], [1], [1], [0, 0, 0, 1, 1, 1], [0], [0]>} : vector<1x8x8xbf16>, vector<1x8x8xbf16>, vector<1x8x8xf32> -> vector<1x8x8xf32>
    "tpu.trace_stop"() : () -> ()
    %cst_30 = arith.constant dense<0xFF800000> : vector<1x8xf32>
    %83 = vector.multi_reduction <maximumf>, %82, %cst_30 [2] : vector<1x8x8xf32> to vector<1x8xf32>
    %84 = vector.shape_cast %83 : vector<1x8xf32> to vector<1x8x1xf32>
    %85 = vector.broadcast %84 : vector<1x8x1xf32> to vector<1x8x8xf32>
    %86 = arith.subf %82, %85 : vector<1x8x8xf32>
    %87 = math.exp %86 : vector<1x8x8xf32>
    %cst_31 = arith.constant dense<0.000000e+00> : vector<1x8xf32>
    %88 = vector.multi_reduction <add>, %87, %cst_31 [2] : vector<1x8x8xf32> to vector<1x8xf32>
    %89 = vector.shape_cast %88 : vector<1x8xf32> to vector<1x8x1xf32>
    %90 = vector.broadcast %89 : vector<1x8x1xf32> to vector<1x8x8xf32>
    %91 = arith.divf %87, %90 : vector<1x8x8xf32>
    %92 = arith.truncf %91 : vector<1x8x8xf32> to vector<1x8x8xbf16>
    "tpu.trace_start"() <{level = 10 : i32, message = "bts,bsd->btd"}> : () -> ()
    %cst_32 = arith.constant dense<0.000000e+00> : vector<1x8x8xf32>
    %93 = tpu.matmul %92, %81, %cst_32 {dimension_numbers = #tpu.dot_dimension_numbers<[2], [1], [1], [2], [0, 0, 0, 1, 1, 2], [0], [0]>} : vector<1x8x8xbf16>, vector<1x8x8xbf16>, vector<1x8x8xf32> -> vector<1x8x8xf32>
    "tpu.trace_stop"() : () -> ()
    %94 = tpu.concatenate %39, %57, %75, %93 in 2 : vector<1x8x8xf32>, vector<1x8x8xf32>, vector<1x8x8xf32>, vector<1x8x8xf32> -> vector<1x8x32xf32>
    %95 = vector.shape_cast %94 : vector<1x8x32xf32> to vector<8x32xf32>
    %96 = arith.truncf %95 : vector<8x32xf32> to vector<8x32xbf16>
    %cst_33 = arith.constant dense<0.000000e+00> : vector<8x32xf32>
    %97 = tpu.matmul %96, %21, %cst_33 {dimension_numbers = #tpu.dot_dimension_numbers<[1], [0], [0], [1], [0, 0, 1, 1], [], []>} : vector<8x32xbf16>, vector<32x32xbf16>, vector<8x32xf32> -> vector<8x32xf32>
    %c0_34 = arith.constant 0 : index
    %c0_35 = arith.constant 0 : index
    %98 = vector.load %arg8[%c0_34, %c0_35] : memref<1x32xf32, #tpu.memory_space<vmem>>, vector<1x32xf32>
    %99 = vector.broadcast %98 : vector<1x32xf32> to vector<8x32xf32>
    %100 = arith.addf %97, %99 : vector<8x32xf32>
    %101 = arith.extf %1 : vector<8x32xbf16> to vector<8x32xf32>
    %102 = arith.addf %101, %100 : vector<8x32xf32>
    %c0_36 = arith.constant 0 : index
    %c0_37 = arith.constant 0 : index
    %103 = vector.load %arg9[%c0_36, %c0_37] : memref<1x32xf32, #tpu.memory_space<vmem>>, vector<1x32xf32>
    %c0_38 = arith.constant 0 : index
    %c0_39 = arith.constant 0 : index
    %104 = vector.load %arg10[%c0_38, %c0_39] : memref<1x32xf32, #tpu.memory_space<vmem>>, vector<1x32xf32>
    %cst_40 = arith.constant dense<0.000000e+00> : vector<8xf32>
    %105 = vector.multi_reduction <add>, %102, %cst_40 [1] : vector<8x32xf32> to vector<8xf32>
    %106 = vector.shape_cast %105 : vector<8xf32> to vector<8x1xf32>
    %cst_41 = arith.constant 3.200000e+01 : f32
    %107 = vector.broadcast %cst_41 : f32 to vector<8x1xf32>
    %108 = arith.divf %106, %107 : vector<8x1xf32>
    %109 = vector.broadcast %108 : vector<8x1xf32> to vector<8x32xf32>
    %110 = arith.subf %102, %109 : vector<8x32xf32>
    %111 = arith.mulf %110, %110 : vector<8x32xf32>
    %cst_42 = arith.constant dense<0.000000e+00> : vector<8xf32>
    %112 = vector.multi_reduction <add>, %111, %cst_42 [1] : vector<8x32xf32> to vector<8xf32>
    %113 = vector.shape_cast %112 : vector<8xf32> to vector<8x1xf32>
    %cst_43 = arith.constant 3.200000e+01 : f32
    %114 = vector.broadcast %cst_43 : f32 to vector<8x1xf32>
    %115 = arith.divf %113, %114 : vector<8x1xf32>
    %cst_44 = arith.constant 9.99999974E-6 : f32
    %116 = vector.broadcast %cst_44 : f32 to vector<8x1xf32>
    %117 = arith.addf %115, %116 : vector<8x1xf32>
    %118 = math.rsqrt %117 : vector<8x1xf32>
    %119 = vector.broadcast %118 : vector<8x1xf32> to vector<8x32xf32>
    %120 = arith.mulf %110, %119 : vector<8x32xf32>
    %121 = vector.broadcast %103 : vector<1x32xf32> to vector<8x32xf32>
    %122 = arith.mulf %120, %121 : vector<8x32xf32>
    %123 = vector.broadcast %104 : vector<1x32xf32> to vector<8x32xf32>
    %124 = arith.addf %122, %123 : vector<8x32xf32>
    %125 = vector.shape_cast %124 : vector<8x32xf32> to vector<1x8x32xf32>
    %126 = arith.truncf %125 : vector<1x8x32xf32> to vector<1x8x32xbf16>
    %c0_45 = arith.constant 0 : index
    %c0_46 = arith.constant 0 : index
    %c0_47 = arith.constant 0 : index
    %127 = vector.load %arg11[%c0_45, %c0_46, %c0_47] : memref<1x8x32xbf16, #tpu.memory_space<vmem>>, vector<1x8x32xbf16>
    tpu.vector_store %arg11[%c0_45, %c0_46, %c0_47], %126 {strides = array<i32>} : memref<1x8x32xbf16, #tpu.memory_space<vmem>>, vector<1x8x32xbf16>,
    return
  }
  func.func @transform_0(%arg0: i32) -> (i32, i32, i32) {
    %c0_i32 = arith.constant 0 : i32
    %c0_i32_0 = arith.constant 0 : i32
    %c0_i32_1 = arith.constant 0 : i32
    return %arg0, %c0_i32, %c0_i32_0 : i32, i32, i32
  }
  func.func @transform_1(%arg0: i32) -> (i32, i32, i32) {
    %c0_i32 = arith.constant 0 : i32
    %c0_i32_0 = arith.constant 0 : i32
    %c0_i32_1 = arith.constant 0 : i32
    return %arg0, %c0_i32, %c0_i32_0 : i32, i32, i32
  }
  func.func @transform_2(%arg0: i32) -> (i32, i32) {
    %c0_i32 = arith.constant 0 : i32
    %c0_i32_0 = arith.constant 0 : i32
    %c0_i32_1 = arith.constant 0 : i32
    return %c0_i32, %c0_i32_0 : i32, i32
  }
  func.func @transform_3(%arg0: i32) -> (i32, i32) {
    %c0_i32 = arith.constant 0 : i32
    %c0_i32_0 = arith.constant 0 : i32
    %c0_i32_1 = arith.constant 0 : i32
    return %c0_i32, %c0_i32_0 : i32, i32
  }
  func.func @transform_4(%arg0: i32) -> (i32, i32) {
    %c0_i32 = arith.constant 0 : i32
    %c0_i32_0 = arith.constant 0 : i32
    %c0_i32_1 = arith.constant 0 : i32
    return %c0_i32, %c0_i32_0 : i32, i32
  }
  func.func @transform_5(%arg0: i32) -> (i32, i32) {
    %c0_i32 = arith.constant 0 : i32
    %c0_i32_0 = arith.constant 0 : i32
    %c0_i32_1 = arith.constant 0 : i32
    return %c0_i32, %c0_i32_0 : i32, i32
  }
  func.func @transform_6(%arg0: i32) -> (i32, i32) {
    %c0_i32 = arith.constant 0 : i32
    %c0_i32_0 = arith.constant 0 : i32
    %c0_i32_1 = arith.constant 0 : i32
    return %c0_i32, %c0_i32_0 : i32, i32
  }
  func.func @transform_7(%arg0: i32) -> (i32, i32) {
    %c0_i32 = arith.constant 0 : i32
    %c0_i32_0 = arith.constant 0 : i32
    %c0_i32_1 = arith.constant 0 : i32
    return %c0_i32, %c0_i32_0 : i32, i32
  }
  func.func @transform_8(%arg0: i32) -> (i32, i32) {
    %c0_i32 = arith.constant 0 : i32
    %c0_i32_0 = arith.constant 0 : i32
    %c0_i32_1 = arith.constant 0 : i32
    return %c0_i32, %c0_i32_0 : i32, i32
  }
  func.func @transform_9(%arg0: i32) -> (i32, i32) {
    %c0_i32 = arith.constant 0 : i32
    %c0_i32_0 = arith.constant 0 : i32
    %c0_i32_1 = arith.constant 0 : i32
    return %c0_i32, %c0_i32_0 : i32, i32
  }
  func.func @transform_10(%arg0: i32) -> (i32, i32, i32) {
    %c0_i32 = arith.constant 0 : i32
    %c0_i32_0 = arith.constant 0 : i32
    %c0_i32_1 = arith.constant 0 : i32
    return %arg0, %c0_i32, %c0_i32_0 : i32, i32, i32
  }
}

module attributes {stable_mosaic.version = 11 : i64} {
  func.func @_ln_vocab_kernel(%arg0: i32, %arg1: i32, %arg2: memref<8x32xbf16, #tpu.memory_space<vmem>>, %arg3: memref<1x32xf32, #tpu.memory_space<vmem>>, %arg4: memref<1x32xf32, #tpu.memory_space<vmem>>, %arg5: memref<32x128xbf16, #tpu.memory_space<vmem>>, %arg6: memref<1x128xf32, #tpu.memory_space<vmem>>, %arg7: memref<8x128xf32, #tpu.memory_space<vmem>>, %arg8: memref<8x32xbf16, #tpu.memory_space<vmem>>) attributes {dimension_semantics = [#tpu.dimension_semantics<parallel>, #tpu.dimension_semantics<arbitrary>], iteration_bounds = array<i64: 2, 1>, scalar_prefetch = 0 : i64, scratch_operands = 1 : i64, tpu.core_type = #tpu.core_type<tc>, window_params = [{transform_indices = @transform_0, window_bounds = array<i64: 8, 32>}, {pipeline_mode = #tpu.pipeline_mode<synchronous>, transform_indices = @transform_1, window_bounds = array<i64: 1, 32>}, {pipeline_mode = #tpu.pipeline_mode<synchronous>, transform_indices = @transform_2, window_bounds = array<i64: 1, 32>}, {transform_indices = @transform_3, window_bounds = array<i64: 32, 128>}, {transform_indices = @transform_4, window_bounds = array<i64: 1, 128>}, {transform_indices = @transform_5, window_bounds = array<i64: 8, 128>}]} {
    %c0_i32 = arith.constant 0 : i32
    %0 = arith.cmpi eq, %arg1, %c0_i32 : i32
    %1 = arith.extui %0 : i1 to i32
    %c0_i32_0 = arith.constant 0 : i32
    %2 = arith.cmpi ne, %1, %c0_i32_0 : i32
    scf.if %2 {
      %c0_8 = arith.constant 0 : index
      %c0_9 = arith.constant 0 : index
      %10 = vector.load %arg2[%c0_8, %c0_9] : memref<8x32xbf16, #tpu.memory_space<vmem>>, vector<8x32xbf16>
      %11 = arith.extf %10 : vector<8x32xbf16> to vector<8x32xf32>
      %c0_10 = arith.constant 0 : index
      %c0_11 = arith.constant 0 : index
      %12 = vector.load %arg3[%c0_10, %c0_11] : memref<1x32xf32, #tpu.memory_space<vmem>>, vector<1x32xf32>
      %c0_12 = arith.constant 0 : index
      %c0_13 = arith.constant 0 : index
      %13 = vector.load %arg4[%c0_12, %c0_13] : memref<1x32xf32, #tpu.memory_space<vmem>>, vector<1x32xf32>
      %cst_14 = arith.constant dense<0.000000e+00> : vector<8xf32>
      %14 = vector.multi_reduction <add>, %11, %cst_14 [1] : vector<8x32xf32> to vector<8xf32>
      %15 = vector.shape_cast %14 : vector<8xf32> to vector<8x1xf32>
      %cst_15 = arith.constant 3.200000e+01 : f32
      %16 = vector.broadcast %cst_15 : f32 to vector<8x1xf32>
      %17 = arith.divf %15, %16 : vector<8x1xf32>
      %18 = vector.broadcast %17 : vector<8x1xf32> to vector<8x32xf32>
      %19 = arith.subf %11, %18 : vector<8x32xf32>
      %20 = arith.mulf %19, %19 : vector<8x32xf32>
      %cst_16 = arith.constant dense<0.000000e+00> : vector<8xf32>
      %21 = vector.multi_reduction <add>, %20, %cst_16 [1] : vector<8x32xf32> to vector<8xf32>
      %22 = vector.shape_cast %21 : vector<8xf32> to vector<8x1xf32>
      %cst_17 = arith.constant 3.200000e+01 : f32
      %23 = vector.broadcast %cst_17 : f32 to vector<8x1xf32>
      %24 = arith.divf %22, %23 : vector<8x1xf32>
      %cst_18 = arith.constant 9.99999974E-6 : f32
      %25 = vector.broadcast %cst_18 : f32 to vector<8x1xf32>
      %26 = arith.addf %24, %25 : vector<8x1xf32>
      %27 = math.rsqrt %26 : vector<8x1xf32>
      %28 = vector.broadcast %27 : vector<8x1xf32> to vector<8x32xf32>
      %29 = arith.mulf %19, %28 : vector<8x32xf32>
      %30 = vector.broadcast %12 : vector<1x32xf32> to vector<8x32xf32>
      %31 = arith.mulf %29, %30 : vector<8x32xf32>
      %32 = vector.broadcast %13 : vector<1x32xf32> to vector<8x32xf32>
      %33 = arith.addf %31, %32 : vector<8x32xf32>
      %34 = arith.truncf %33 : vector<8x32xf32> to vector<8x32xbf16>
      %c0_19 = arith.constant 0 : index
      %c0_20 = arith.constant 0 : index
      %35 = vector.load %arg8[%c0_19, %c0_20] : memref<8x32xbf16, #tpu.memory_space<vmem>>, vector<8x32xbf16>
      tpu.vector_store %arg8[%c0_19, %c0_20], %34 {strides = array<i32>} : memref<8x32xbf16, #tpu.memory_space<vmem>>, vector<8x32xbf16>,
    } else {
    }
    %c0 = arith.constant 0 : index
    %c0_1 = arith.constant 0 : index
    %3 = vector.load %arg8[%c0, %c0_1] : memref<8x32xbf16, #tpu.memory_space<vmem>>, vector<8x32xbf16>
    %c0_2 = arith.constant 0 : index
    %c0_3 = arith.constant 0 : index
    %4 = vector.load %arg5[%c0_2, %c0_3] : memref<32x128xbf16, #tpu.memory_space<vmem>>, vector<32x128xbf16>
    %cst = arith.constant dense<0.000000e+00> : vector<8x128xf32>
    %5 = tpu.matmul %3, %4, %cst {dimension_numbers = #tpu.dot_dimension_numbers<[1], [0], [0], [1], [0, 0, 1, 1], [], []>} : vector<8x32xbf16>, vector<32x128xbf16>, vector<8x128xf32> -> vector<8x128xf32>
    %c0_4 = arith.constant 0 : index
    %c0_5 = arith.constant 0 : index
    %6 = vector.load %arg6[%c0_4, %c0_5] : memref<1x128xf32, #tpu.memory_space<vmem>>, vector<1x128xf32>
    %7 = vector.broadcast %6 : vector<1x128xf32> to vector<8x128xf32>
    %8 = arith.addf %5, %7 : vector<8x128xf32>
    %c0_6 = arith.constant 0 : index
    %c0_7 = arith.constant 0 : index
    %9 = vector.load %arg7[%c0_6, %c0_7] : memref<8x128xf32, #tpu.memory_space<vmem>>, vector<8x128xf32>
    tpu.vector_store %arg7[%c0_6, %c0_7], %8 {strides = array<i32>} : memref<8x128xf32, #tpu.memory_space<vmem>>, vector<8x128xf32>,
    return
  }
  func.func @transform_0(%arg0: i32, %arg1: i32) -> (i32, i32) {
    %c0_i32 = arith.constant 0 : i32
    %c0_i32_0 = arith.constant 0 : i32
    return %arg0, %c0_i32 : i32, i32
  }
  func.func @transform_1(%arg0: i32, %arg1: i32) -> (i32, i32) {
    %c0_i32 = arith.constant 0 : i32
    %c0_i32_0 = arith.constant 0 : i32
    %c0_i32_1 = arith.constant 0 : i32
    return %c0_i32, %c0_i32_0 : i32, i32
  }
  func.func @transform_2(%arg0: i32, %arg1: i32) -> (i32, i32) {
    %c0_i32 = arith.constant 0 : i32
    %c0_i32_0 = arith.constant 0 : i32
    %c0_i32_1 = arith.constant 0 : i32
    return %c0_i32, %c0_i32_0 : i32, i32
  }
  func.func @transform_3(%arg0: i32, %arg1: i32) -> (i32, i32) {
    %c0_i32 = arith.constant 0 : i32
    %c0_i32_0 = arith.constant 0 : i32
    return %c0_i32, %arg1 : i32, i32
  }
  func.func @transform_4(%arg0: i32, %arg1: i32) -> (i32, i32) {
    %c0_i32 = arith.constant 0 : i32
    %c0_i32_0 = arith.constant 0 : i32
    return %c0_i32, %arg1 : i32, i32
  }
  func.func @transform_5(%arg0: i32, %arg1: i32) -> (i32, i32) {
    %c0_i32 = arith.constant 0 : i32
    return %arg0, %arg1 : i32, i32
  }
}

</mosaic_0001>

<bundles_post_ra>
// kernel: transformer_forward.16
= control target key start
LH: loop header
LB: loop body
LE: loop exit
PB: predicated region body
PF: predicated region fallthrough
CT: control target
= control target key end

     0   :  { %s304_s12 = smov 0   ;;  %s327_s0 = inlined_call_operand.vmem [shape: bf16[16,32], index: 0, kind: input, shape index: {}]   ;;  %s328_s1 = inlined_call_operand.vmem [shape: f32[1,32], index: 1, kind: input, shape index: {}]   ;;  %s329_s2 = inlined_call_operand.vmem [shape: f32[1,32], index: 2, kind: input, shape index: {}]   ;;  %s330_s3 = inlined_call_operand.vmem [shape: bf16[16,32], index: 3, kind: output, shape index: {}]  }
   0x1 LB: > { %s255_s13 = sadd.s32 4294967295, %s282_s12   ;;  %p259_p0 = scmp.ge.s32.totalorder %s282_s12, 1  ;;  %s282_s12 = sphi %s304_s12, %s13_s12  }
   0x2   : > { %p136_p1 = scmp.lt.s32.totalorder %s282_s12, 3 }
   0x4   : > { %p137_p2 = pnand %p259_p0, %p136_p1 }
   0x5   : > { %p158_p3 = scmp.lt.s32.totalorder (!%p137_p2), %s255_s13, 1 }
   0x6   : > { %140 = sbr.rel (%p137_p2) target bundleno = 328 (0x148), region = 32 }
   0xb   : > { %s332_s13 = smov (!%p158_p3, %s255_s13), 1  ;;  %vm170_vm0 = vcmask 261120   ;;  %v262_v12 = vld [vmem:[%s328_s1] ss:$0 sm:$0xff]  ;;  %vm200_vm1 = vcmask 257024  }
   0xc   : > { %s260_s14 = sshll.u32 %s332_s13, 2  ;;  %v263_v14 = vld [vmem:[%s329_s2] ss:$0 sm:$0xff] }
   0xd   : > { %s161_s17 = scalar_lea.vmem %s327_s0, %s260_s14  ;;  %s165_s24 = scalar_lea.vmem %s330_s3, %s260_s14 }
   0xe   : > { %v166_v0 = vld [vmem:[%s161_s17] sm:$0xf] }
   0xf   : > { %v167_v1 = vunpack.c.l.bf16 %v166_v0 }
  0x11   : > { %v171_v2 = vsel %vm170_vm0, %v167_v1, 0.0 }
  0x12   : > { %172 = vadd.xlane.f32.xlu0 %v171_v2 }
  0x9b   : > { %v173_v3 = vpop.xlane.xlu0 %172 }
  0x9c   : > { %v175_v4 = vmul.f32 0.03125, %v173_v3 }
  0x9e   : > { %v176_v5 = vsub.f32 %v167_v1, %v175_v4 }
  0xa0   : > { %v177_v6 = vmul.f32 %v176_v5, %v176_v5 }
  0xa2   : > { %v178_v7 = vsel %vm170_vm0, %v177_v6, 0.0 }
  0xa3   : > { %179 = vadd.xlane.f32.xlu0 %v178_v7 }
 0x12c   : > { %v180_v8 = vpop.xlane.xlu0 %179 }
 0x12d   : > { %v181_v9 = vmul.f32 0.03125, %v180_v8 }
 0x12f   : > { %v182_v10 = vadd.f32 1e-05, %v181_v9 }
 0x131   : > { %274 = vrsqrt.f32 %v182_v10 }
 0x13e   : > { %v275_v11 = vpop.eup %274 }
 0x13f   : > { %v184_v13 = vmul.f32 %v275_v11, %v176_v5 }
 0x141   : > { %v191_v15 = vmul.f32 %v262_v12, %v184_v13 }
 0x143   : > { %v198_v16 = vadd.f32 %v263_v14, %v191_v15 }
 0x145   : > { %v199_v17 = vpack.c.bf16 %v198_v16, %v198_v16 }
 0x147   : > { %201 = vst.msk [vmem:[%s165_s24] sm:$0xf] %vm200_vm1, %v199_v17 }
 0x148 PF: > { %s13_s12 = sadd.s32 1, %s282_s12  }
 0x149   : > { %p10_p4 = scmp.ge.s32.totalorder %s13_s12, 4  }
 0x14b   :  { %12 = sbr.rel (!%p10_p4) target bundleno = 1 (0x1), region = 62 }

// kernel: transformer_forward.13
= control target key start
LH: loop header
LB: loop body
LE: loop exit
PB: predicated region body
PF: predicated region fallthrough
CT: control target
= control target key end

     0   :  { %s798_s24 = smov 0   ;;  %s800_s25 = smov 0   ;;  %s873_s0 = inlined_call_operand.vmem [shape: bf16[16,32], index: 0, kind: input, shape index: {}]   ;;  %s874_s1 = inlined_call_operand.vmem [shape: bf16[32,64], index: 1, kind: input, shape index: {}]   ;;  %s875_s2 = inlined_call_operand.vmem [shape: f32[1,64], index: 2, kind: input, shape index: {}]   ;;  %s876_s3 = inlined_call_operand.vmem [shape: bf16[64,32], index: 3, kind: input, shape index: {}]   ;;  %s877_s4 = inlined_call_operand.vmem [shape: f32[1,32], index: 4, kind: input, shape index: {}]   ;;  %s878_s5 = inlined_call_operand.vmem [shape: f32[1,32], index: 5, kind: input, shape index: {}]   ;;  %s879_s6 = inlined_call_operand.vmem [shape: f32[1,32], index: 6, kind: input, shape index: {}]   ;;  %s880_s7 = inlined_call_operand.vmem [shape: bf16[16,32], index: 7, kind: output, shape index: {}]  }
   0x1   :  { %s802_s26 = smov 0  }
   0x2 LB: > { %s29_s27 = sadd.s32 1, %s750_s25  ;;  %p653_p0 = scmp.ge.s32.totalorder %s754_s26, 1  ;;  %s754_s26 = sphi %s802_s26, %s17_s26   ;;  %s750_s25 = sphi %s800_s25, %s882_s25   ;;  %s746_s24 = sphi %s798_s24, %s881_s24  }
   0x3   : > { %p31_p1 = scmp.ge.s32.totalorder %s29_s27, 2  ;;  %p276_p2 = scmp.lt.s32.totalorder %s754_s26, 3 }
   0x5   : > { %s884_s27 = smov (%p31_p1, %s29_s27), 0  ;;  %p277_p3 = pnand %p653_p0, %p276_p2 }
   0x6   : > { %p318_p4 = scmp.lt.s32.totalorder (!%p277_p3), %s746_s24, 1 }
   0x7   : > { %280 = sbr.rel (%p277_p3) target bundleno = 738 (0x2e2), region = 48 }
   0xc   : > { %v724_v0 = vld [vmem:[%s874_s1 + $0x8] sm:$0xff]   ;;  %v756_v1 = vmov 0.0   ;;  %v725_v2 = vld [vmem:[%s874_s1] sm:$0xff]   ;;  %vm757_vm0 = vmmov 0   ;;  %vm344_vm1 = vcmask 261120   ;;  %v726_v3 = vld [vmem:[%s876_s3 + $0x18] sm:$0xff]  }
   0xd   : > { %678 = vmatprep.subr.bf16.mxu0 %v756_v1  ;;  %686 = vmatprep.subr.bf16.mxu1 %v756_v1  ;;  %345 = vst.msk [vmem:[#allocation2] sm:$0xff] %vm344_vm1, %v756_v1  ;;  %s886_s24 = smov (!%p318_p4, %s746_s24), 1  ;;  %v727_v4 = vld [vmem:[%s876_s3 + $0x10] sm:$0xff]   ;;  %v728_v6 = vld [vmem:[%s876_s3 + $0x8] sm:$0xff]   ;;  %v729_v7 = vld [vmem:[%s876_s3] sm:$0xff]   ;;  %vm449_vm2 = vcmask 523264  }
   0xe   : > { %679 = vmatpush3.bf16.msra.mxu0 %v724_v0  ;;  %682 = vmatprep.mubr.msk.bf16.mxu0 %vm757_vm0, %v756_v1  ;;  %s654_s13 = sshll.u32 %s886_s24, 2  ;;  %v656_v8 = vld [vmem:[%s875_s2] ss:$0 sm:$0xff]  ;;  %vm540_vm3 = vcmask 257024  }
   0xf   : > { %680 = vmatprep.subr.bf16.mxu0 %v756_v1  ;;  %694 = vmatprep.mubr.msk.bf16.mxu1 %vm757_vm0, %v756_v1  ;;  %s321_s16 = scalar_lea.vmem %s873_s0, %s654_s13  ;;  %v665_v24 = vld [vmem:[%s877_s4] ss:$0 sm:$0xff]  ;;  %s338_s12 = scalar_lea.vmem %s880_s7, %s654_s13 }
  0x10   : > { %687 = vmatpush3.bf16.msra.mxu1 %v726_v3  ;;  %v346_v5 = vld [vmem:[%s321_s16] sm:$0xf] }
  0x11   : > { %688 = vmatprep.subr.bf16.mxu1 %v756_v1  ;;  %v498_v22 = vunpack.c.l.bf16 %v346_v5  ;;  %v666_v37 = vld [vmem:[%s878_s5] ss:$0 sm:$0xff] }
  0x12   : > { %681 = vmatpush3.bf16.msra.mxu0 %v725_v2  ;;  %v667_v39 = vld [vmem:[%s879_s6] ss:$0 sm:$0xff] }
  0x14   : > { %689 = vmatpush3.bf16.msra.mxu1 %v727_v4  ;;  %v415_v16 = vld [vmem:[#allocation2] sm:$0xff] }
  0x15   : > { %683 = vmatmul.mubr.msk.bf16.vlgmr.msra.gmra.mxu0 %vm344_vm1, %v346_v5  ;;  %690 = vmatprep.subr.bf16.mxu1 %v756_v1 }
  0x18   : > { %691 = vmatpush3.bf16.msra.mxu1 %v728_v6 }
  0x19   : > { %692 = vmatprep.subr.bf16.mxu1 %v756_v1 }
  0x1c   : > { %693 = vmatpush3.bf16.msra.mxu1 %v729_v7 }
  0xd5   : > { %v408_v9 = vpop.f32.mrf.mxu0 }
  0xd6   : > { %v409_v10 = vadd.f32 %v656_v8, %v408_v9 }
  0xd7   : > { %v684_v11 = vpop.f32.mrf.mxu0 }
  0xd8   : > { %v414_v12 = vmax.f32 %v409_v10, 0.0 }
  0xd9   : > { %v411_v13 = vpop.f32.mrf.mxu0 }
  0xda   : > { %v416_v14 = vpack.c.bf16 %v414_v12, %v414_v12 }
  0xdb   : > { %v685_v15 = vpop.f32.mrf.mxu0 }
  0xdc   : > { %695 = vmatmul.mubr.msk.bf16.vlgmr.msra.gmra.mxu1 %vm449_vm2, %v416_v14 }
 0x19c   : > { %v487_v17 = vpop.f32.mrf.mxu1 }
 0x19d   : > { %v493_v18 = vadd.f32 %v487_v17, %v415_v16 }
 0x19e   : > { %v696_v19 = vpop.f32.mrf.mxu1 }
 0x19f   : > { %494 = vst.msk [vmem:[#allocation2] sm:$0xff] %vm344_vm1, %v493_v18 }
 0x1a0   : > { %v490_v20 = vpop.f32.mrf.mxu1 }
 0x1a2   : > { %v697_v21 = vpop.f32.mrf.mxu1 }
 0x1a6   : > { %v499_v23 = vld [vmem:[#allocation2] sm:$0xff] }
 0x1a7   : > { %v500_v25 = vadd.f32 %v499_v23, %v498_v22 }
 0x1a9   : > { %v508_v26 = vadd.f32 %v665_v24, %v500_v25 }
 0x1ab   : > { %v511_v27 = vsel %vm344_vm1, %v508_v26, 0.0 }
 0x1ac   : > { %512 = vadd.xlane.f32.xlu0 %v511_v27 }
 0x235   : > { %v513_v28 = vpop.xlane.xlu0 %512 }
 0x236   : > { %v515_v29 = vmul.f32 0.03125, %v513_v28 }
 0x238   : > { %v516_v30 = vsub.f32 %v508_v26, %v515_v29 }
 0x23a   : > { %v517_v31 = vmul.f32 %v516_v30, %v516_v30 }
 0x23c   : > { %v518_v32 = vsel %vm344_vm1, %v517_v31, 0.0 }
 0x23d   : > { %519 = vadd.xlane.f32.xlu0 %v518_v32 }
 0x2c6   : > { %v520_v33 = vpop.xlane.xlu0 %519 }
 0x2c7   : > { %v521_v34 = vmul.f32 0.03125, %v520_v33 }
 0x2c9   : > { %v522_v35 = vadd.f32 1e-05, %v521_v34 }
 0x2cb   : > { %730 = vrsqrt.f32 %v522_v35 }
 0x2d8   : > { %v731_v36 = vpop.eup %730 }
 0x2d9   : > { %v524_v38 = vmul.f32 %v731_v36, %v516_v30 }
 0x2db   : > { %v531_v40 = vmul.f32 %v666_v37, %v524_v38 }
 0x2dd   : > { %v538_v41 = vadd.f32 %v667_v39, %v531_v40 }
 0x2df   : > { %v539_v42 = vpack.c.bf16 %v538_v41, %v538_v41 }
 0x2e1   : > { %541 = vst.msk [vmem:[%s338_s12] sm:$0xf] %vm540_vm3, %v539_v42 }
 0x2e2 PF: > { %s17_s26 = sadd.s32 1, %s754_s26   ;;  %s881_s24 = smov %s750_s25 }
 0x2e3   : > { %p14_p5 = scmp.ge.s32.totalorder %s17_s26, 4   ;;  %s882_s25 = smov %s884_s27 }
 0x2e5   :  { %16 = sbr.rel (!%p14_p5) target bundleno = 2 (0x2), region = 95 }

// kernel: transformer_forward.18
= control target key start
LH: loop header
LB: loop body
LE: loop exit
PB: predicated region body
PF: predicated region fallthrough
CT: control target
= control target key end

     0   :  { %s1383_s13 = smov 0   ;;  %s1521_s0 = inlined_call_operand.vmem [shape: bf16[2,8,32], index: 0, kind: input, shape index: {}]   ;;  %s1522_s1 = inlined_call_operand.vmem [shape: bf16[2,8,32], index: 1, kind: input, shape index: {}]   ;;  %s1523_s2 = inlined_call_operand.vmem [shape: bf16[32,32], index: 2, kind: input, shape index: {}]   ;;  %s1524_s3 = inlined_call_operand.vmem [shape: f32[1,32], index: 3, kind: input, shape index: {}]   ;;  %s1525_s4 = inlined_call_operand.vmem [shape: bf16[32,64], index: 4, kind: input, shape index: {}]   ;;  %s1526_s5 = inlined_call_operand.vmem [shape: f32[1,64], index: 5, kind: input, shape index: {}]   ;;  %s1527_s6 = inlined_call_operand.vmem [shape: bf16[32,32], index: 6, kind: input, shape index: {}]   ;;  %s1528_s7 = inlined_call_operand.vmem [shape: f32[1,32], index: 7, kind: input, shape index: {}]   ;;  %s1529_s8 = inlined_call_operand.vmem [shape: f32[1,32], index: 8, kind: input, shape index: {}]   ;;  %s1530_s9 = inlined_call_operand.vmem [shape: f32[1,32], index: 9, kind: input, shape index: {}]   ;;  %s1531_s10 = inlined_call_operand.vmem [shape: bf16[2,8,32], index: 10, kind: output, shape index: {}]  }
   0x1 LB: > { %s1135_s14 = sadd.s32 4294967295, %s1314_s13   ;;  %p1139_p0 = scmp.ge.s32.totalorder %s1314_s13, 1  ;;  %s1314_s13 = sphi %s1383_s13, %s20_s13  }
   0x2   : > { %p320_p1 = scmp.lt.s32.totalorder %s1314_s13, 3 }
   0x4   : > { %p321_p2 = pnand %p1139_p0, %p320_p1 }
   0x5   : > { %p360_p3 = scmp.lt.s32.totalorder (!%p321_p2), %s1135_s14, 1  ;;  %s1318_s15 = smov (!%p321_p2), 112  }
   0x6   : > { %324 = sbr.rel (%p321_p2) target bundleno = 1689 (0x699), region = 60  ;;  %s1319_s16 = smov (!%p321_p2), 120  }
   0x7   : > { %s1320_s17 = smov (!%p321_p2), 104   ;;  %s1321_s18 = smov (!%p321_p2), 96  }
   0x8   : > { %s1322_s19 = smov (!%p321_p2), 80   ;;  %s1323_s20 = smov (!%p321_p2), 72  }
   0x9   : > { %s1324_s21 = smov (!%p321_p2), 88   ;;  %s1325_s25 = smov (!%p321_p2), 8  }
   0xa   : > { %s1326_s28 = smov (!%p321_p2), 16  }
   0xb   : > { %v1284_v0 = vld [vmem:[%s1523_s2 + $0x8] sm:$0xff]   ;;  %v1316_v1 = vmov 0.0   ;;  %v1286_v3 = vld [vmem:[%s1523_s2] sm:$0xff]   ;;  %vm1317_vm0 = vmmov 0   ;;  %s1533_s14 = smov (!%p360_p3, %s1135_s14), 1  ;;  %vm398_vm1 = vcmask 261120  }
   0xc   : > { %1192 = vmatprep.subr.bf16.mxu0 %v1316_v1  ;;  %1200 = vmatprep.subr.bf16.mxu1 %v1316_v1  ;;  %v1285_v2 = vld [vmem:[%s1525_s4 + $0x8] sm:$0xff]   ;;  %v1287_v4 = vld [vmem:[%s1525_s4] sm:$0xff]   ;;  %s1411_s23 = sshll.u32 %s1533_s14, 2  ;;  %vm515_vm2 = vcmask 64512   ;;  %vm580_vm3 = vcmask 1043456   ;;  %vm968_vm4 = vcmask 130048  }
   0xd   : > { %1193 = vmatpush3.bf16.msra.mxu0 %v1284_v0  ;;  %1196 = vmatprep.mubr.msk.bf16.mxu0 %vm1317_vm0, %v1316_v1  ;;  %s363_s26 = scalar_lea.vmem %s1521_s0, %s1411_s23  ;;  %s367_s29 = scalar_lea.vmem %s1522_s1, %s1411_s23  ;;  %v1143_v7 = vld [vmem:[%s1524_s3] ss:$0 sm:$0xff]  ;;  %vm970_vm5 = vcmask 195584   ;;  %vm1068_vm6 = vcmask 257024  }
   0xe   : > { %1201 = vmatpush3.bf16.msra.mxu1 %v1285_v2  ;;  %1194 = vmatprep.subr.bf16.mxu0 %v1316_v1  ;;  %v1418_v5 = vld [vmem:[%s363_s26] sm:$0xf] }
   0xf   : > { %1202 = vmatprep.subr.bf16.mxu1 %v1316_v1  ;;  %1204 = vmatprep.mubr.msk.bf16.mxu1 %vm1317_vm0, %v1316_v1  ;;  %v374_v6 = vld [vmem:[%s367_s29] sm:$0xf]  ;;  %s1327_s29 = smov 24  }
  0x10   : > { %v1147_v8 = vld [vmem:[%s1526_s5] ss:$0 sm:$0xff] }
  0x11   : > { %1195 = vmatpush3.bf16.msra.mxu0 %v1286_v3 }
  0x12   : > { %1203 = vmatpush3.bf16.msra.mxu1 %v1287_v4  ;;  %1208 = vmatprep.subr.bf16.mxu0 %v1316_v1 }
  0x13   : > { %1214 = vmatprep.subr.bf16.mxu1 %v1316_v1 }
  0x14   : > { %1197 = vmatmul.mubr.msk.bf16.vlgmr.msra.gmra.mxu0 %vm398_vm1, %v1418_v5 }
  0x15   : > { %1205 = vmatmul.mubr.msk.bf16.vlgmr.msra.gmra.mxu1 %vm398_vm1, %v374_v6  ;;  %1210 = vmatprep.mubr.msk.bf16.mxu0 %vm1317_vm0, %v1316_v1 }
  0x16   : > { %1216 = vmatprep.mubr.msk.bf16.mxu1 %vm1317_vm0, %v1316_v1 }
  0xd4   : > { %v436_v9 = vpop.f32.mrf.mxu0 }
  0xd5   : > { %v437_v10 = vadd.f32 %v1143_v7, %v436_v9  ;;  %v503_v11 = vpop.f32.mrf.mxu1 }
  0xd6   : > { %v504_v12 = vadd.f32 %v1147_v8, %v503_v11  ;;  %v1198_v13 = vpop.f32.mrf.mxu0 }
  0xd7   : > { %v442_v14 = vmul.f32 0.35355338, %v437_v10  ;;  %v1206_v15 = vpop.f32.mrf.mxu1 }
  0xd8   : > { %v1438_v16 = vpack.c.bf16 %v504_v12, %v504_v12  ;;  %v439_v17 = vpop.f32.mrf.mxu0 }
  0xd9   : > { %v506_v18 = vpop.f32.mrf.mxu1  ;;  %v513_v19 = vpack.c.bf16 %v442_v14, %v442_v14 }
  0xda   : > { %737 = vrot.lane.b32.xlu1 %v1438_v16, %s1318_s15  ;;  %627 = vrot.lane.b32.xlu0 %v1438_v16, %s1319_s16  ;;  %v1199_v20 = vpop.f32.mrf.mxu0  ;;  %v520_v21 = vsel %vm515_vm2, %v1438_v16, 0 }
  0xdb   : > { %v1207_v22 = vpop.f32.mrf.mxu1  ;;  %1209 = vmatpush3.bf16.xpose.msra.mxu0 %v520_v21 }
  0xdc   : > { %1220 = vmatprep.subr.bf16.mxu0 %v1316_v1 }
  0xde   : > { %735 = vrot.lane.b32.xlu1 %v513_v19, %s1318_s15  ;;  %625 = vrot.lane.b32.xlu0 %v513_v19, %s1319_s16 }
  0xe2   : > { %845 = vrot.lane.b32.xlu1 %v513_v19, %s1320_s17  ;;  %847 = vrot.lane.b32.xlu0 %v1438_v16, %s1320_s17 }
  0xe3   : > { %1211 = vmatmul.mubr.msk.bf16.vlgmr.msra.gmra.mxu0 %vm515_vm2, %v513_v19 }
  0xe4   : > { %1222 = vmatprep.mubr.msk.bf16.mxu0 %vm1317_vm0, %v1316_v1 }
 0x14c   : > { %v628_v23 = vpop.permute.xlu0 %627  ;;  %v738_v25 = vpop.permute.xlu1 %737 }
 0x14d   : > { %v633_v24 = vsel %vm515_vm2, %v628_v23, 0  ;;  %v743_v27 = vsel %vm515_vm2, %v738_v25, 0 }
 0x14e   : > { %1221 = vmatpush3.bf16.xpose.msra.mxu0 %v633_v24 }
 0x14f   : > { %1232 = vmatprep.subr.bf16.mxu0 %v1316_v1 }
 0x150   : > { %v626_v26 = vpop.permute.xlu0 %625  ;;  %v736_v29 = vpop.permute.xlu1 %735 }
 0x154   : > { %v848_v28 = vpop.permute.xlu0 %847  ;;  %v846_v31 = vpop.permute.xlu1 %845 }
 0x155   : > { %1223 = vmatmul.mubr.msk.bf16.vlgmr.msra.gmra.mxu0 %vm515_vm2, %v626_v26  ;;  %v853_v30 = vsel %vm515_vm2, %v848_v28, 0 }
 0x156   : > { %1233 = vmatpush3.bf16.xpose.msra.mxu0 %v743_v27  ;;  %1234 = vmatprep.mubr.msk.bf16.mxu0 %vm1317_vm0, %v1316_v1 }
 0x157   : > { %1244 = vmatprep.subr.bf16.mxu0 %v1316_v1 }
 0x15d   : > { %1235 = vmatmul.mubr.msk.bf16.vlgmr.msra.gmra.mxu0 %vm515_vm2, %v736_v29 }
 0x15e   : > { %1245 = vmatpush3.bf16.xpose.msra.mxu0 %v853_v30  ;;  %1246 = vmatprep.mubr.msk.bf16.mxu0 %vm1317_vm0, %v1316_v1 }
 0x15f   : > { %1256 = vmatprep.subr.bf16.mxu0 %v1316_v1 }
 0x165   : > { %1247 = vmatmul.mubr.msk.bf16.vlgmr.msra.gmra.mxu0 %vm515_vm2, %v846_v31 }
 0x166   : > { %1260 = vmatprep.mubr.msk.bf16.mxu0 %vm1317_vm0, %v1316_v1 }
 0x1a3   : > { %v556_v32 = vpop.f32.mrf.mxu0 }
 0x1a4   : > { %v562_v33 = vsel %vm515_vm2, %v556_v32, -inf }
 0x1a5   : > { %563 = vmax.xlane.f32.xlu0 %v562_v33  ;;  %v1212_v34 = vpop.f32.mrf.mxu0 }
 0x1a7   : > { %v559_v35 = vpop.f32.mrf.mxu0 }
 0x1a9   : > { %v1213_v36 = vpop.f32.mrf.mxu0 }
 0x215   : > { %v669_v37 = vpop.f32.mrf.mxu0 }
 0x216   : > { %v675_v38 = vsel %vm515_vm2, %v669_v37, -inf }
 0x217   : > { %676 = vmax.xlane.f32.xlu1 %v675_v38  ;;  %v1224_v39 = vpop.f32.mrf.mxu0  ;;  %v1288_v38 = vld [vmem:[%s1527_s6 + $0x8] sm:$0xff]  }
 0x218   : > { %1257 = vmatpush3.bf16.msra.mxu0 %v1288_v38 }
 0x219   : > { %v672_v40 = vpop.f32.mrf.mxu0  ;;  %1258 = vmatprep.subr.bf16.mxu0 %v1316_v1 }
 0x21b   : > { %v1225_v41 = vpop.f32.mrf.mxu0 }
 0x21c   : > { %v1289_v41 = vld [vmem:[%s1527_s6] sm:$0xff]  }
 0x21d   : > { %v779_v42 = vpop.f32.mrf.mxu0  ;;  %1259 = vmatpush3.bf16.msra.mxu0 %v1289_v41 }
 0x21e   : > { %v785_v43 = vsel %vm515_vm2, %v779_v42, -inf }
 0x21f   : > { %786 = vmax.xlane.f32.xlu0 %v785_v43  ;;  %v1236_v44 = vpop.f32.mrf.mxu0 }
 0x221   : > { %v782_v45 = vpop.f32.mrf.mxu0 }
 0x223   : > { %v1237_v46 = vpop.f32.mrf.mxu0 }
 0x225   : > { %v889_v47 = vpop.f32.mrf.mxu0 }
 0x226   : > { %v895_v48 = vsel %vm515_vm2, %v889_v47, -inf }
 0x227   : > { %896 = vmax.xlane.f32.xlu0 %v895_v48  ;;  %v1248_v49 = vpop.f32.mrf.mxu0 }
 0x229   : > { %v892_v50 = vpop.f32.mrf.mxu0 }
 0x22b   : > { %v1249_v51 = vpop.f32.mrf.mxu0 }
 0x22e   : > { %v564_v52 = vpop.xlane.xlu0 %563 }
 0x22f   : > { %v565_v53 = vsub.f32 %v556_v32, %v564_v52 }
 0x231   : > { %v566_v54 = vmul.f32 1.442695, %v565_v53 }
 0x233   : > { %1290 = vpow2.f32 %v566_v54 }
 0x240   : > { %v1291_v55 = vpop.eup %1290 }
 0x241   : > { %v568_v56 = vsel %vm515_vm2, %v1291_v55, 0.0 }
 0x242   : > { %569 = vadd.xlane.f32.xlu1 %v568_v56 }
 0x253   : > { %575 = vrot.lane.b32.xlu1 %v1438_v16, %s1321_s18 }
 0x2a0   : > { %v677_v57 = vpop.xlane.xlu1 %676 }
 0x2a1   : > { %v678_v58 = vsub.f32 %v669_v37, %v677_v57 }
 0x2a3   : > { %v679_v59 = vmul.f32 1.442695, %v678_v58  ;;  %v1159_v58 = vld [vmem:[%s1528_s7] ss:$0 sm:$0xff] }
 0x2a5   : > { %1292 = vpow2.f32 %v679_v59  ;;  %v1035_v59 = vunpack.c.l.bf16 %v1418_v5 }
 0x2a8   : > { %v787_v60 = vpop.xlane.xlu0 %786 }
 0x2a9   : > { %v788_v61 = vsub.f32 %v779_v42, %v787_v60 }
 0x2ab   : > { %v789_v62 = vmul.f32 1.442695, %v788_v61 }
 0x2ad   : > { %1294 = vpow2.f32 %v789_v62 }
 0x2b0   : > { %v897_v63 = vpop.xlane.xlu0 %896 }
 0x2b1   : > { %v898_v0 = vsub.f32 %v889_v47, %v897_v63 }
 0x2b2   : > { %v1293_v2 = vpop.eup %1292 }
 0x2b3   : > { %v899_v3 = vmul.f32 1.442695, %v898_v0  ;;  %v681_v4 = vsel %vm515_vm2, %v1293_v2, 0.0 }
 0x2b4   : > { %682 = vadd.xlane.f32.xlu0 %v681_v4 }
 0x2b5   : > { %1296 = vpow2.f32 %v899_v3 }
 0x2ba   : > { %v1295_v6 = vpop.eup %1294 }
 0x2bb   : > { %v791_v7 = vsel %vm515_vm2, %v1295_v6, 0.0 }
 0x2bc   : > { %792 = vadd.xlane.f32.xlu1 %v791_v7 }
 0x2c2   : > { %v1297_v8 = vpop.eup %1296 }
 0x2c3   : > { %v901_v9 = vsel %vm515_vm2, %v1297_v8, 0.0 }
 0x2c4   : > { %902 = vadd.xlane.f32.xlu0 %v901_v9 }
 0x2cb   : > { %v570_v10 = vpop.xlane.xlu1 %569 }
 0x2cc   : > { %1298 = vrcp.f32 %v570_v10 }
 0x2cd   : > { %797 = vrot.lane.b32.xlu1 %v1438_v16, %s1322_s19  ;;  %s371_s19 = scalar_lea.vmem %s1531_s10, %s1411_s23 }
 0x2cf   : > { %v576_v11 = vpop.permute.xlu1 %575 }
 0x2d0   : > { %v582_v12 = vsel %vm580_vm3, %v576_v11, 0 }
 0x2d1   : > { %1215 = vmatpush3.bf16.msra.mxu1 %v582_v12  ;;  %907 = vrot.lane.b32.xlu1 %v1438_v16, %s1323_s20 }
 0x2d2   : > { %1226 = vmatprep.subr.bf16.mxu1 %v1316_v1 }
 0x2d9   : > { %v1299_v13 = vpop.eup %1298 }
 0x2da   : > { %687 = vrot.lane.b32.xlu0 %v1438_v16, %s1324_s21  ;;  %v572_v14 = vmul.f32 %v1299_v13, %v1291_v55  ;;  %v1163_v13 = vld [vmem:[%s1529_s8] ss:$0 sm:$0xff] }
 0x2dc   : > { %v573_v15 = vpack.c.bf16 %v572_v14, %v572_v14 }
 0x2de   : > { %1217 = vmatmul.mubr.msk.bf16.vlgmr.msra.gmra.mxu1 %vm515_vm2, %v573_v15  ;;  %v1164_v15 = vld [vmem:[%s1530_s9] ss:$0 sm:$0xff] }
 0x2df   : > { %1228 = vmatprep.mubr.msk.bf16.mxu1 %vm1317_vm0, %v1316_v1 }
 0x33d   : > { %v683_v17 = vpop.xlane.xlu0 %682 }
 0x33e   : > { %1300 = vrcp.f32 %v683_v17 }
 0x345   : > { %v793_v18 = vpop.xlane.xlu1 %792 }
 0x346   : > { %1302 = vrcp.f32 %v793_v18 }
 0x349   : > { %v798_v24 = vpop.permute.xlu1 %797 }
 0x34a   : > { %v803_v26 = vsel %vm580_vm3, %v798_v24, 0 }
 0x34b   : > { %v1301_v19 = vpop.eup %1300 }
 0x34c   : > { %v685_v21 = vmul.f32 %v1301_v19, %v1293_v2 }
 0x34d   : > { %v903_v20 = vpop.xlane.xlu0 %902  ;;  %v908_v28 = vpop.permute.xlu1 %907 }
 0x34e   : > { %1304 = vrcp.f32 %v903_v20  ;;  %v686_v16 = vpack.c.bf16 %v685_v21, %v685_v21  ;;  %v913_v31 = vsel %vm580_vm3, %v908_v28, 0 }
 0x351   : > { %v688_v22 = vpop.permute.xlu0 %687 }
 0x352   : > { %v693_v23 = vsel %vm580_vm3, %v688_v22, 0 }
 0x353   : > { %1227 = vmatpush3.bf16.msra.mxu1 %v693_v23  ;;  %v1303_v25 = vpop.eup %1302 }
 0x354   : > { %1238 = vmatprep.subr.bf16.mxu1 %v1316_v1  ;;  %v795_v27 = vmul.f32 %v1303_v25, %v1295_v6 }
 0x356   : > { %1229 = vmatmul.mubr.msk.bf16.vlgmr.msra.gmra.mxu1 %vm515_vm2, %v686_v16  ;;  %v796_v29 = vpack.c.bf16 %v795_v27, %v795_v27 }
 0x357   : > { %1239 = vmatpush3.bf16.msra.mxu1 %v803_v26  ;;  %1240 = vmatprep.mubr.msk.bf16.mxu1 %vm1317_vm0, %v1316_v1 }
 0x358   : > { %1250 = vmatprep.subr.bf16.mxu1 %v1316_v1 }
 0x35b   : > { %v1305_v30 = vpop.eup %1304 }
 0x35c   : > { %v905_v32 = vmul.f32 %v1305_v30, %v1297_v8 }
 0x35e   : > { %1241 = vmatmul.mubr.msk.bf16.vlgmr.msra.gmra.mxu1 %vm515_vm2, %v796_v29  ;;  %v906_v33 = vpack.c.bf16 %v905_v32, %v905_v32 }
 0x35f   : > { %1251 = vmatpush3.bf16.msra.mxu1 %v913_v31  ;;  %1252 = vmatprep.mubr.msk.bf16.mxu1 %vm1317_vm0, %v1316_v1 }
 0x366   : > { %1253 = vmatmul.mubr.msk.bf16.vlgmr.msra.gmra.mxu1 %vm515_vm2, %v906_v33 }
 0x39e   : > { %v618_v34 = vpop.f32.mrf.mxu1 }
 0x3a0   : > { %v1218_v35 = vpop.f32.mrf.mxu1 }
 0x3a2   : > { %v621_v36 = vpop.f32.mrf.mxu1 }
 0x3a4   : > { %v1219_v37 = vpop.f32.mrf.mxu1 }
 0x416   : > { %v729_v39 = vpop.f32.mrf.mxu1 }
 0x417   : > { %956 = vrot.lane.b32.xlu0 %v729_v39, %s1325_s25 }
 0x418   : > { %v1230_v40 = vpop.f32.mrf.mxu1 }
 0x41a   : > { %v732_v42 = vpop.f32.mrf.mxu1 }
 0x41c   : > { %v1231_v43 = vpop.f32.mrf.mxu1 }
 0x41e   : > { %v839_v44 = vpop.f32.mrf.mxu1 }
 0x41f   : > { %960 = vrot.lane.b32.xlu1 %v839_v44, %s1326_s28 }
 0x420   : > { %v1242_v45 = vpop.f32.mrf.mxu1 }
 0x422   : > { %v842_v46 = vpop.f32.mrf.mxu1 }
 0x424   : > { %v1243_v47 = vpop.f32.mrf.mxu1 }
 0x426   : > { %v949_v48 = vpop.f32.mrf.mxu1 }
 0x427   : > { %964 = vrot.lane.b32.xlu0 %v949_v48, %s1327_s29 }
 0x428   : > { %v1254_v1 = vpop.f32.mrf.mxu1 }
 0x42a   : > { %v952_v49 = vpop.f32.mrf.mxu1 }
 0x42c   : > { %v1255_v50 = vpop.f32.mrf.mxu1 }
 0x489   : > { %v957_v51 = vpop.permute.xlu0 %956 }
 0x48a   : > { %v967_v53 = vsel %vm515_vm2, %v618_v34, %v957_v51 }
 0x491   : > { %v961_v52 = vpop.permute.xlu1 %960 }
 0x492   : > { %v969_v54 = vsel %vm968_vm4, %v967_v53, %v961_v52 }
 0x499   : > { %v965_v55 = vpop.permute.xlu0 %964 }
 0x49a   : > { %v971_v56 = vsel %vm970_vm5, %v969_v54, %v965_v55 }
 0x49b   : > { %v972_v57 = vpack.c.bf16 %v971_v56, %v971_v56 }
 0x49d   : > { %1261 = vmatmul.mubr.msk.bf16.vlgmr.msra.gmra.mxu0 %vm398_vm1, %v972_v57 }
 0x55d   : > { %v1029_v60 = vpop.f32.mrf.mxu0 }
 0x55e   : > { %v1030_v61 = vadd.f32 %v1159_v58, %v1029_v60 }
 0x55f   : > { %v1262_v62 = vpop.f32.mrf.mxu0 }
 0x560   : > { %v1036_v63 = vadd.f32 %v1035_v59, %v1030_v61 }
 0x561   : > { %v1032_v0 = vpop.f32.mrf.mxu0 }
 0x562   : > { %v1039_v2 = vsel %vm398_vm1, %v1036_v63, 0.0 }
 0x563   : > { %1040 = vadd.xlane.f32.xlu1 %v1039_v2  ;;  %v1263_v3 = vpop.f32.mrf.mxu0 }
 0x5ec   : > { %v1041_v4 = vpop.xlane.xlu1 %1040 }
 0x5ed   : > { %v1043_v6 = vmul.f32 0.03125, %v1041_v4 }
 0x5ef   : > { %v1044_v7 = vsub.f32 %v1036_v63, %v1043_v6 }
 0x5f1   : > { %v1045_v8 = vmul.f32 %v1044_v7, %v1044_v7 }
 0x5f3   : > { %v1046_v9 = vsel %vm398_vm1, %v1045_v8, 0.0 }
 0x5f4   : > { %1047 = vadd.xlane.f32.xlu0 %v1046_v9 }
 0x67d   : > { %v1048_v10 = vpop.xlane.xlu0 %1047 }
 0x67e   : > { %v1049_v11 = vmul.f32 0.03125, %v1048_v10 }
 0x680   : > { %v1050_v5 = vadd.f32 1e-05, %v1049_v11 }
 0x682   : > { %1306 = vrsqrt.f32 %v1050_v5 }
 0x68f   : > { %v1307_v12 = vpop.eup %1306 }
 0x690   : > { %v1052_v14 = vmul.f32 %v1307_v12, %v1044_v7 }
 0x692   : > { %v1059_v17 = vmul.f32 %v1163_v13, %v1052_v14 }
 0x694   : > { %v1066_v18 = vadd.f32 %v1164_v15, %v1059_v17 }
 0x696   : > { %v1067_v19 = vpack.c.bf16 %v1066_v18, %v1066_v18 }
 0x698   : > { %1069 = vst.msk [vmem:[%s371_s19] sm:$0xf] %vm1068_vm6, %v1067_v19 }
 0x699 PF: > { %s20_s13 = sadd.s32 1, %s1314_s13  }
 0x69a   : > { %p17_p4 = scmp.ge.s32.totalorder %s20_s13, 4  }
 0x69c   :  { %19 = sbr.rel (!%p17_p4) target bundleno = 1 (0x1), region = 93 }

// kernel: transformer_forward.12
= control target key start
LH: loop header
LB: loop body
LE: loop exit
PB: predicated region body
PF: predicated region fallthrough
CT: control target
= control target key end

     0   :  { %s1183_s24 = smov 0   ;;  %s1306_s0 = inlined_call_operand.vmem [shape: bf16[2,8,32], index: 0, kind: input, shape index: {}]   ;;  %s1307_s1 = inlined_call_operand.vmem [shape: bf16[32,96], index: 1, kind: input, shape index: {}]   ;;  %s1308_s2 = inlined_call_operand.vmem [shape: f32[1,96], index: 2, kind: input, shape index: {}]   ;;  %s1309_s3 = inlined_call_operand.vmem [shape: bf16[32,32], index: 3, kind: input, shape index: {}]   ;;  %s1310_s4 = inlined_call_operand.vmem [shape: f32[1,32], index: 4, kind: input, shape index: {}]   ;;  %s1311_s5 = inlined_call_operand.vmem [shape: f32[1,32], index: 5, kind: input, shape index: {}]   ;;  %s1312_s6 = inlined_call_operand.vmem [shape: f32[1,32], index: 6, kind: input, shape index: {}]   ;;  %s1313_s7 = inlined_call_operand.vmem [shape: bf16[2,8,32], index: 7, kind: output, shape index: {}]  }
   0x1 LB: > { %s960_s25 = sadd.s32 4294967295, %s1125_s24   ;;  %p964_p0 = scmp.ge.s32.totalorder %s1125_s24, 1  ;;  %s1125_s24 = sphi %s1183_s24, %s17_s24  }
   0x2   : > { %p236_p1 = scmp.lt.s32.totalorder %s1125_s24, 3 }
   0x4   : > { %p237_p2 = pnand %p964_p0, %p236_p1 }
   0x5   : > { %p266_p3 = scmp.lt.s32.totalorder (!%p237_p2), %s960_s25, 1  ;;  %s1129_s13 = smov (!%p237_p2), 96  }
   0x6   : > { %240 = sbr.rel (%p237_p2) target bundleno = 1727 (0x6bf), region = 48  ;;  %s1130_s14 = smov (!%p237_p2), 120  }
   0x7   : > { %s1131_s15 = smov (!%p237_p2), 88   ;;  %s1132_s16 = smov (!%p237_p2), 80  }
   0x8   : > { %s1133_s17 = smov (!%p237_p2), 112   ;;  %s1134_s18 = smov (!%p237_p2), 72  }
   0x9   : > { %s1135_s19 = smov (!%p237_p2), 104   ;;  %s1136_s20 = smov (!%p237_p2), 56  }
   0xa   : > { %s1137_s21 = smov (!%p237_p2), 64   ;;  %s1138_s22 = smov (!%p237_p2), 40  }
   0xb   : > { %v1097_v0 = vld [vmem:[%s1307_s1 + $0x8] sm:$0xff]   ;;  %v1127_v1 = vmov 0.0   ;;  %v1098_v2 = vld [vmem:[%s1307_s1] sm:$0xff]   ;;  %vm1128_vm0 = vmmov 0   ;;  %s1315_s25 = smov (!%p266_p3, %s960_s25), 1  ;;  %vm299_vm1 = vcmask 261120  }
   0xc   : > { %1009 = vmatprep.subr.bf16.mxu0 %v1127_v1  ;;  %1017 = vmatprep.subr.bf16.mxu1 %v1127_v1  ;;  %s965_s30 = sshll.u32 %s1315_s25, 2  ;;  %v967_v4 = vld [vmem:[%s1308_s2] ss:$0 sm:$0xff]  ;;  %vm353_vm2 = vcmask 64512   ;;  %s1139_s23 = smov 48   ;;  %vm417_vm3 = vcmask 1043456  }
   0xd   : > { %1010 = vmatpush3.bf16.msra.mxu0 %v1097_v0  ;;  %1013 = vmatprep.mubr.msk.bf16.mxu0 %vm1128_vm0, %v1127_v1  ;;  %s269_s10 = scalar_lea.vmem %s1306_s0, %s965_s30  ;;  %s1140_s26 = smov 8   ;;  %vm805_vm4 = vcmask 130048   ;;  %vm807_vm5 = vcmask 195584   ;;  %vm905_vm6 = vcmask 257024  }
   0xe   : > { %1011 = vmatprep.subr.bf16.mxu0 %v1127_v1  ;;  %1019 = vmatprep.mubr.msk.bf16.mxu1 %vm1128_vm0, %v1127_v1  ;;  %v1213_v3 = vld [vmem:[%s269_s10] sm:$0xf]  ;;  %s1141_s9 = smov 16   ;;  %s1142_s10 = smov 24  }
  0x11   : > { %1012 = vmatpush3.bf16.msra.mxu0 %v1098_v2 }
  0x12   : > { %1023 = vmatprep.subr.bf16.mxu0 %v1127_v1 }
  0x14   : > { %1014 = vmatmul.mubr.msk.bf16.vlgmr.msra.gmra.mxu0 %vm299_vm1, %v1213_v3 }
  0x15   : > { %1025 = vmatprep.mubr.msk.bf16.mxu0 %vm1128_vm0, %v1127_v1 }
  0xd4   : > { %v337_v5 = vpop.f32.mrf.mxu0 }
  0xd5   : > { %v338_v6 = vadd.f32 %v967_v4, %v337_v5 }
  0xd6   : > { %v1015_v7 = vpop.f32.mrf.mxu0 }
  0xd7   : > { %v343_v8 = vmul.f32 0.35355338, %v338_v6  ;;  %v1222_v9 = vpack.c.bf16 %v338_v6, %v338_v6 }
  0xd8   : > { %v340_v10 = vpop.f32.mrf.mxu0 }
  0xd9   : > { %v348_v11 = vpack.c.bf16 %v343_v8, %v343_v8  ;;  %351 = vrot.lane.b32.xlu0 %v1222_v9, %s1129_s13 }
  0xda   : > { %v1016_v12 = vpop.f32.mrf.mxu0 }
  0xdb   : > { %462 = vrot.lane.b32.xlu1 %v348_v11, %s1130_s14 }
  0xdd   : > { %464 = vrot.lane.b32.xlu0 %v1222_v9, %s1131_s15 }
  0xdf   : > { %574 = vrot.lane.b32.xlu1 %v1222_v9, %s1132_s16 }
  0xe1   : > { %572 = vrot.lane.b32.xlu0 %v348_v11, %s1133_s17 }
  0xe3   : > { %684 = vrot.lane.b32.xlu1 %v1222_v9, %s1134_s18 }
  0xe5   : > { %682 = vrot.lane.b32.xlu0 %v348_v11, %s1135_s19  ;;  %s273_s19 = scalar_lea.vmem %s1313_s7, %s965_s30 }
 0x14b   : > { %v352_v13 = vpop.permute.xlu0 %351 }
 0x14c   : > { %v358_v14 = vsel %vm353_vm2, %v352_v13, 0 }
 0x14d   : > { %1018 = vmatpush3.bf16.xpose.msra.mxu1 %v358_v14  ;;  %v463_v16 = vpop.permute.xlu1 %462 }
 0x14e   : > { %1029 = vmatprep.subr.bf16.mxu1 %v1127_v1 }
 0x14f   : > { %v465_v15 = vpop.permute.xlu0 %464 }
 0x150   : > { %v470_v17 = vsel %vm353_vm2, %v465_v15, 0 }
 0x151   : > { %v575_v18 = vpop.permute.xlu1 %574 }
 0x152   : > { %v580_v19 = vsel %vm353_vm2, %v575_v18, 0 }
 0x153   : > { %v573_v21 = vpop.permute.xlu0 %572 }
 0x154   : > { %1020 = vmatmul.mubr.msk.bf16.vlgmr.msra.gmra.mxu1 %vm353_vm2, %v348_v11 }
 0x155   : > { %1030 = vmatpush3.bf16.xpose.msra.mxu1 %v470_v17  ;;  %1031 = vmatprep.mubr.msk.bf16.mxu1 %vm1128_vm0, %v1127_v1  ;;  %v685_v20 = vpop.permute.xlu1 %684 }
 0x156   : > { %1041 = vmatprep.subr.bf16.mxu1 %v1127_v1  ;;  %v690_v22 = vsel %vm353_vm2, %v685_v20, 0 }
 0x157   : > { %v683_v23 = vpop.permute.xlu0 %682 }
 0x15c   : > { %1032 = vmatmul.mubr.msk.bf16.vlgmr.msra.gmra.mxu1 %vm353_vm2, %v463_v16 }
 0x15d   : > { %1042 = vmatpush3.bf16.xpose.msra.mxu1 %v580_v19  ;;  %1043 = vmatprep.mubr.msk.bf16.mxu1 %vm1128_vm0, %v1127_v1 }
 0x15e   : > { %1053 = vmatprep.subr.bf16.mxu1 %v1127_v1 }
 0x164   : > { %1044 = vmatmul.mubr.msk.bf16.vlgmr.msra.gmra.mxu1 %vm353_vm2, %v573_v21 }
 0x165   : > { %1054 = vmatpush3.bf16.xpose.msra.mxu1 %v690_v22  ;;  %1055 = vmatprep.mubr.msk.bf16.mxu1 %vm1128_vm0, %v1127_v1 }
 0x166   : > { %1065 = vmatprep.subr.bf16.mxu1 %v1127_v1 }
 0x16c   : > { %1056 = vmatmul.mubr.msk.bf16.vlgmr.msra.gmra.mxu1 %vm353_vm2, %v683_v23 }
 0x16d   : > { %1069 = vmatprep.mubr.msk.bf16.mxu1 %vm1128_vm0, %v1127_v1 }
 0x214   : > { %v394_v24 = vpop.f32.mrf.mxu1 }
 0x215   : > { %v400_v25 = vsel %vm353_vm2, %v394_v24, -inf }
 0x216   : > { %401 = vmax.xlane.f32.xlu1 %v400_v25  ;;  %v1021_v26 = vpop.f32.mrf.mxu1 }
 0x218   : > { %v397_v27 = vpop.f32.mrf.mxu1 }
 0x21a   : > { %v1022_v28 = vpop.f32.mrf.mxu1 }
 0x21c   : > { %v506_v29 = vpop.f32.mrf.mxu1 }
 0x21d   : > { %v512_v30 = vsel %vm353_vm2, %v506_v29, -inf }
 0x21e   : > { %513 = vmax.xlane.f32.xlu0 %v512_v30  ;;  %v1033_v31 = vpop.f32.mrf.mxu1 }
 0x220   : > { %v509_v32 = vpop.f32.mrf.mxu1 }
 0x222   : > { %v1034_v33 = vpop.f32.mrf.mxu1 }
 0x224   : > { %v616_v34 = vpop.f32.mrf.mxu1 }
 0x225   : > { %v622_v35 = vsel %vm353_vm2, %v616_v34, -inf }
 0x226   : > { %623 = vmax.xlane.f32.xlu0 %v622_v35  ;;  %v1045_v36 = vpop.f32.mrf.mxu1  ;;  %v1100_v35 = vld [vmem:[%s1309_s3] sm:$0xff]  }
 0x228   : > { %v619_v37 = vpop.f32.mrf.mxu1 }
 0x22a   : > { %v1046_v38 = vpop.f32.mrf.mxu1 }
 0x22c   : > { %v726_v39 = vpop.f32.mrf.mxu1 }
 0x22d   : > { %v732_v40 = vsel %vm353_vm2, %v726_v39, -inf }
 0x22e   : > { %733 = vmax.xlane.f32.xlu1 %v732_v40  ;;  %v1057_v41 = vpop.f32.mrf.mxu1 }
 0x230   : > { %v729_v42 = vpop.f32.mrf.mxu1 }
 0x232   : > { %v1058_v43 = vpop.f32.mrf.mxu1 }
 0x29f   : > { %v402_v44 = vpop.xlane.xlu1 %401 }
 0x2a0   : > { %v403_v45 = vsub.f32 %v394_v24, %v402_v44 }
 0x2a2   : > { %v404_v46 = vmul.f32 1.442695, %v403_v45 }
 0x2a4   : > { %1101 = vpow2.f32 %v404_v46 }
 0x2a7   : > { %v514_v47 = vpop.xlane.xlu0 %513 }
 0x2a8   : > { %v515_v48 = vsub.f32 %v506_v29, %v514_v47 }
 0x2aa   : > { %v516_v49 = vmul.f32 1.442695, %v515_v48 }
 0x2ac   : > { %1103 = vpow2.f32 %v516_v49 }
 0x2af   : > { %v624_v50 = vpop.xlane.xlu0 %623 }
 0x2b0   : > { %v625_v51 = vsub.f32 %v616_v34, %v624_v50  ;;  %v1099_v34 = vld [vmem:[%s1309_s3 + $0x8] sm:$0xff]   ;;  %v979_v50 = vld [vmem:[%s1310_s4] ss:$0 sm:$0xff] }
 0x2b1   : > { %v1102_v52 = vpop.eup %1101  ;;  %1066 = vmatpush3.bf16.msra.mxu1 %v1099_v34 }
 0x2b2   : > { %v626_v53 = vmul.f32 1.442695, %v625_v51  ;;  %v406_v54 = vsel %vm353_vm2, %v1102_v52, 0.0  ;;  %1067 = vmatprep.subr.bf16.mxu1 %v1127_v1  ;;  %v872_v51 = vunpack.c.l.bf16 %v1213_v3 }
 0x2b3   : > { %407 = vadd.xlane.f32.xlu0 %v406_v54 }
 0x2b4   : > { %1105 = vpow2.f32 %v626_v53 }
 0x2b5   : > { %1068 = vmatpush3.bf16.msra.mxu1 %v1100_v35 }
 0x2b7   : > { %v734_v59 = vpop.xlane.xlu1 %733 }
 0x2b8   : > { %v735_v60 = vsub.f32 %v726_v39, %v734_v59 }
 0x2b9   : > { %v1104_v55 = vpop.eup %1103 }
 0x2ba   : > { %v518_v56 = vsel %vm353_vm2, %v1104_v55, 0.0  ;;  %v736_v61 = vmul.f32 1.442695, %v735_v60 }
 0x2bb   : > { %519 = vadd.xlane.f32.xlu1 %v518_v56 }
 0x2bc   : > { %1107 = vpow2.f32 %v736_v61 }
 0x2c1   : > { %v1106_v57 = vpop.eup %1105 }
 0x2c2   : > { %v628_v58 = vsel %vm353_vm2, %v1106_v57, 0.0 }
 0x2c3   : > { %629 = vadd.xlane.f32.xlu0 %v628_v58 }
 0x2c9   : > { %v1108_v62 = vpop.eup %1107 }
 0x2ca   : > { %v738_v63 = vsel %vm353_vm2, %v1108_v62, 0.0 }
 0x2cc   : > { %524 = vrot.lane.b32.xlu1 %v1222_v9, %s1136_s20 }
 0x2d9   : > { %412 = vrot.lane.b32.xlu0 %v1222_v9, %s1137_s21 }
 0x2dd   : > { %744 = vrot.lane.b32.xlu0 %v1222_v9, %s1138_s22 }
 0x2f0   : > { %739 = vadd.xlane.f32.xlu1 %v738_v63 }
 0x301   : > { %634 = vrot.lane.b32.xlu1 %v1222_v9, %s1139_s23 }
 0x33c   : > { %v408_v0 = vpop.xlane.xlu0 %407 }
 0x33d   : > { %1109 = vrcp.f32 %v408_v0 }
 0x344   : > { %v520_v2 = vpop.xlane.xlu1 %519 }
 0x345   : > { %1111 = vrcp.f32 %v520_v2 }
 0x348   : > { %v525_v10 = vpop.permute.xlu1 %524 }
 0x349   : > { %v530_v13 = vsel %vm417_vm3, %v525_v10, 0 }
 0x34a   : > { %v1110_v4 = vpop.eup %1109 }
 0x34b   : > { %v410_v6 = vmul.f32 %v1110_v4, %v1102_v52 }
 0x34c   : > { %v630_v5 = vpop.xlane.xlu0 %629 }
 0x34d   : > { %v411_v11 = vpack.c.bf16 %v410_v6, %v410_v6  ;;  %1113 = vrcp.f32 %v630_v5  ;;  %v983_v5 = vld [vmem:[%s1311_s5] ss:$0 sm:$0xff] }
 0x350   : > { %v413_v7 = vpop.permute.xlu0 %412 }
 0x351   : > { %v419_v8 = vsel %vm417_vm3, %v413_v7, 0  ;;  %v984_v7 = vld [vmem:[%s1312_s6] ss:$0 sm:$0xff] }
 0x352   : > { %1024 = vmatpush3.bf16.msra.mxu0 %v419_v8  ;;  %v1112_v12 = vpop.eup %1111 }
 0x353   : > { %1035 = vmatprep.subr.bf16.mxu0 %v1127_v1  ;;  %v522_v9 = vmul.f32 %v1112_v12, %v1104_v55 }
 0x354   : > { %v745_v20 = vpop.permute.xlu0 %744 }
 0x355   : > { %1026 = vmatmul.mubr.msk.bf16.vlgmr.msra.gmra.mxu0 %vm353_vm2, %v411_v11  ;;  %v523_v14 = vpack.c.bf16 %v522_v9, %v522_v9  ;;  %v750_v22 = vsel %vm417_vm3, %v745_v20, 0 }
 0x356   : > { %1036 = vmatpush3.bf16.msra.mxu0 %v530_v13  ;;  %1037 = vmatprep.mubr.msk.bf16.mxu0 %vm1128_vm0, %v1127_v1 }
 0x357   : > { %1047 = vmatprep.subr.bf16.mxu0 %v1127_v1 }
 0x35a   : > { %v1114_v15 = vpop.eup %1113 }
 0x35b   : > { %v632_v17 = vmul.f32 %v1114_v15, %v1106_v57 }
 0x35d   : > { %1038 = vmatmul.mubr.msk.bf16.vlgmr.msra.gmra.mxu0 %vm353_vm2, %v523_v14  ;;  %v633_v21 = vpack.c.bf16 %v632_v17, %v632_v17 }
 0x35e   : > { %1049 = vmatprep.mubr.msk.bf16.mxu0 %vm1128_vm0, %v1127_v1 }
 0x379   : > { %v740_v16 = vpop.xlane.xlu1 %739 }
 0x37a   : > { %1115 = vrcp.f32 %v740_v16 }
 0x37d   : > { %v635_v18 = vpop.permute.xlu1 %634 }
 0x37e   : > { %v640_v19 = vsel %vm417_vm3, %v635_v18, 0 }
 0x37f   : > { %1048 = vmatpush3.bf16.msra.mxu0 %v640_v19 }
 0x380   : > { %1059 = vmatprep.subr.bf16.mxu0 %v1127_v1 }
 0x382   : > { %1050 = vmatmul.mubr.msk.bf16.vlgmr.msra.gmra.mxu0 %vm353_vm2, %v633_v21 }
 0x383   : > { %1060 = vmatpush3.bf16.msra.mxu0 %v750_v22  ;;  %1061 = vmatprep.mubr.msk.bf16.mxu0 %vm1128_vm0, %v1127_v1 }
 0x387   : > { %v1116_v23 = vpop.eup %1115 }
 0x388   : > { %v742_v24 = vmul.f32 %v1116_v23, %v1108_v62 }
 0x38a   : > { %v743_v25 = vpack.c.bf16 %v742_v24, %v742_v24 }
 0x38c   : > { %1062 = vmatmul.mubr.msk.bf16.vlgmr.msra.gmra.mxu0 %vm353_vm2, %v743_v25 }
 0x415   : > { %v455_v26 = vpop.f32.mrf.mxu0 }
 0x417   : > { %v1027_v27 = vpop.f32.mrf.mxu0 }
 0x419   : > { %v458_v28 = vpop.f32.mrf.mxu0 }
 0x41b   : > { %v1028_v29 = vpop.f32.mrf.mxu0 }
 0x41d   : > { %v566_v30 = vpop.f32.mrf.mxu0 }
 0x41e   : > { %793 = vrot.lane.b32.xlu1 %v566_v30, %s1140_s26 }
 0x41f   : > { %v1039_v31 = vpop.f32.mrf.mxu0 }
 0x421   : > { %v569_v32 = vpop.f32.mrf.mxu0 }
 0x423   : > { %v1040_v33 = vpop.f32.mrf.mxu0 }
 0x442   : > { %v676_v36 = vpop.f32.mrf.mxu0 }
 0x443   : > { %797 = vrot.lane.b32.xlu0 %v676_v36, %s1141_s9 }
 0x444   : > { %v1051_v37 = vpop.f32.mrf.mxu0 }
 0x446   : > { %v679_v38 = vpop.f32.mrf.mxu0 }
 0x448   : > { %v1052_v39 = vpop.f32.mrf.mxu0 }
 0x44c   : > { %v786_v40 = vpop.f32.mrf.mxu0 }
 0x44d   : > { %801 = vrot.lane.b32.xlu1 %v786_v40, %s1142_s10 }
 0x44e   : > { %v1063_v41 = vpop.f32.mrf.mxu0 }
 0x450   : > { %v789_v42 = vpop.f32.mrf.mxu0 }
 0x452   : > { %v1064_v43 = vpop.f32.mrf.mxu0 }
 0x490   : > { %v794_v44 = vpop.permute.xlu1 %793 }
 0x491   : > { %v804_v45 = vsel %vm353_vm2, %v455_v26, %v794_v44 }
 0x4b5   : > { %v798_v1 = vpop.permute.xlu0 %797 }
 0x4b6   : > { %v806_v46 = vsel %vm805_vm4, %v804_v45, %v798_v1 }
 0x4bf   : > { %v802_v47 = vpop.permute.xlu1 %801 }
 0x4c0   : > { %v808_v48 = vsel %vm807_vm5, %v806_v46, %v802_v47 }
 0x4c1   : > { %v809_v49 = vpack.c.bf16 %v808_v48, %v808_v48 }
 0x4c3   : > { %1070 = vmatmul.mubr.msk.bf16.vlgmr.msra.gmra.mxu1 %vm299_vm1, %v809_v49 }
 0x583   : > { %v866_v52 = vpop.f32.mrf.mxu1 }
 0x584   : > { %v867_v53 = vadd.f32 %v979_v50, %v866_v52 }
 0x585   : > { %v1071_v54 = vpop.f32.mrf.mxu1 }
 0x586   : > { %v873_v55 = vadd.f32 %v872_v51, %v867_v53 }
 0x587   : > { %v869_v56 = vpop.f32.mrf.mxu1 }
 0x588   : > { %v876_v57 = vsel %vm299_vm1, %v873_v55, 0.0 }
 0x589   : > { %877 = vadd.xlane.f32.xlu0 %v876_v57  ;;  %v1072_v58 = vpop.f32.mrf.mxu1 }
 0x612   : > { %v878_v59 = vpop.xlane.xlu0 %877 }
 0x613   : > { %v880_v60 = vmul.f32 0.03125, %v878_v59 }
 0x615   : > { %v881_v61 = vsub.f32 %v873_v55, %v880_v60 }
 0x617   : > { %v882_v62 = vmul.f32 %v881_v61, %v881_v61 }
 0x619   : > { %v883_v63 = vsel %vm299_vm1, %v882_v62, 0.0 }
 0x61a   : > { %884 = vadd.xlane.f32.xlu1 %v883_v63 }
 0x6a3   : > { %v885_v0 = vpop.xlane.xlu1 %884 }
 0x6a4   : > { %v886_v2 = vmul.f32 0.03125, %v885_v0 }
 0x6a6   : > { %v887_v3 = vadd.f32 1e-05, %v886_v2 }
 0x6a8   : > { %1117 = vrsqrt.f32 %v887_v3 }
 0x6b5   : > { %v1118_v4 = vpop.eup %1117 }
 0x6b6   : > { %v889_v6 = vmul.f32 %v1118_v4, %v881_v61 }
 0x6b8   : > { %v896_v8 = vmul.f32 %v983_v5, %v889_v6 }
 0x6ba   : > { %v903_v10 = vadd.f32 %v984_v7, %v896_v8 }
 0x6bc   : > { %v904_v11 = vpack.c.bf16 %v903_v10, %v903_v10 }
 0x6be   : > { %906 = vst.msk [vmem:[%s273_s19] sm:$0xf] %vm905_vm6, %v904_v11 }
 0x6bf PF: > { %s17_s24 = sadd.s32 1, %s1125_s24  }
 0x6c0   : > { %p14_p4 = scmp.ge.s32.totalorder %s17_s24, 4  }
 0x6c2   :  { %16 = sbr.rel (!%p14_p4) target bundleno = 1 (0x1), region = 78 }

// kernel: transformer_forward.23
= control target key start
LH: loop header
LB: loop body
LE: loop exit
PB: predicated region body
PF: predicated region fallthrough
CT: control target
= control target key end

     0   :  { %s594_s18 = smov 0   ;;  %s596_s19 = smov 0   ;;  %s649_s0 = inlined_call_operand.vmem [shape: bf16[16,32], index: 0, kind: input, shape index: {}]   ;;  %s650_s1 = inlined_call_operand.vmem [shape: f32[1,32], index: 1, kind: input, shape index: {}]   ;;  %s651_s2 = inlined_call_operand.vmem [shape: f32[1,32], index: 2, kind: input, shape index: {}]   ;;  %s652_s3 = inlined_call_operand.vmem [shape: bf16[32,128], index: 3, kind: input, shape index: {}]   ;;  %s653_s4 = inlined_call_operand.vmem [shape: f32[1,128], index: 4, kind: input, shape index: {}]   ;;  %s654_s5 = inlined_call_operand.vmem [shape: f32[16,128], index: 5, kind: output, shape index: {}]  }
   0x1   :  { %s598_s20 = smov 0  }
   0x2 LB: > { %s27_s21 = sadd.s32 1, %s556_s19  ;;  %p486_p0 = scmp.ge.s32.totalorder %s560_s20, 1  ;;  %s560_s20 = sphi %s598_s20, %s15_s20   ;;  %s556_s19 = sphi %s596_s19, %s656_s19   ;;  %s552_s18 = sphi %s594_s18, %s655_s18  }
   0x3   : > { %p29_p1 = scmp.ge.s32.totalorder %s27_s21, 2  ;;  %p217_p2 = scmp.lt.s32.totalorder %s560_s20, 3 }
   0x5   : > { %s658_s21 = smov (%p29_p1, %s27_s21), 0  ;;  %p218_p3 = pnand %p486_p0, %p217_p2 }
   0x6   : > { %p253_p4 = scmp.lt.s32.totalorder (!%p218_p3), %s552_s18, 1 }
   0x7   : > { %221 = sbr.rel (%p218_p3) target bundleno = 535 (0x217), region = 40 }
   0xc   : > { %s660_s18 = smov (!%p253_p4, %s552_s18), 1  ;;  %vm280_vm0 = vcmask 261120   ;;  %v534_v8 = vld [vmem:[%s652_s3 + $0x8] sm:$0xff]   ;;  %v562_v9 = vmov 0.0   ;;  %v535_v10 = vld [vmem:[%s652_s3] sm:$0xff]   ;;  %vm563_vm1 = vmmov 0  }
   0xd   : > { %s487_s22 = sshll.u32 %s660_s18, 2  ;;  %500 = vmatprep.subr.bf16.mxu0 %v562_v9  ;;  %504 = vmatprep.mubr.msk.bf16.mxu0 %vm563_vm1, %v562_v9  ;;  %v489_v15 = vld [vmem:[%s650_s1] ss:$0 sm:$0xff]  ;;  %vm310_vm2 = vcmask 257024   ;;  %s488_s9 = sshll.u32 %s660_s18, 3 }
   0xe   : > { %s256_s25 = scalar_lea.vmem %s649_s0, %s487_s22  ;;  %501 = vmatpush3.bf16.msra.mxu0 %v534_v8  ;;  %v490_v17 = vld [vmem:[%s651_s2] ss:$0 sm:$0xff]  ;;  %s270_s14 = scalar_lea.vmem %s654_s5, %s488_s9 }
   0xf   : > { %v276_v0 = vld [vmem:[%s256_s25] sm:$0xf]  ;;  %502 = vmatprep.subr.bf16.mxu0 %v562_v9 }
  0x10   : > { %v277_v1 = vunpack.c.l.bf16 %v276_v0  ;;  %v491_v22 = vld [vmem:[%s653_s4] ss:$0 sm:$0xff] }
  0x12   : > { %v281_v2 = vsel %vm280_vm0, %v277_v1, 0.0  ;;  %503 = vmatpush3.bf16.msra.mxu0 %v535_v10 }
  0x13   : > { %282 = vadd.xlane.f32.xlu0 %v281_v2 }
  0x9c   : > { %v283_v3 = vpop.xlane.xlu0 %282 }
  0x9d   : > { %v285_v4 = vmul.f32 0.03125, %v283_v3 }
  0x9f   : > { %v286_v5 = vsub.f32 %v277_v1, %v285_v4 }
  0xa1   : > { %v287_v6 = vmul.f32 %v286_v5, %v286_v5 }
  0xa3   : > { %v288_v7 = vsel %vm280_vm0, %v287_v6, 0.0 }
  0xa4   : > { %289 = vadd.xlane.f32.xlu0 %v288_v7 }
 0x12d   : > { %v290_v11 = vpop.xlane.xlu0 %289 }
 0x12e   : > { %v291_v12 = vmul.f32 0.03125, %v290_v11 }
 0x130   : > { %v292_v13 = vadd.f32 1e-05, %v291_v12 }
 0x132   : > { %536 = vrsqrt.f32 %v292_v13 }
 0x13f   : > { %v537_v14 = vpop.eup %536 }
 0x140   : > { %v294_v16 = vmul.f32 %v537_v14, %v286_v5 }
 0x142   : > { %v301_v18 = vmul.f32 %v489_v15, %v294_v16 }
 0x144   : > { %v308_v19 = vadd.f32 %v490_v17, %v301_v18 }
 0x146   : > { %v309_v20 = vpack.c.bf16 %v308_v19, %v308_v19 }
 0x148   : > { %311 = vst.msk [vmem:[#allocation2] sm:$0xf] %vm310_vm2, %v309_v20 }
 0x14f   : > { %v312_v21 = vld [vmem:[#allocation2] sm:$0xf] }
 0x150   : > { %505 = vmatmul.mubr.msk.bf16.vlgmr.msra.gmra.mxu0 %vm280_vm0, %v312_v21 }
 0x210   : > { %v374_v23 = vpop.f32.mrf.mxu0 }
 0x211   : > { %v375_v24 = vadd.f32 %v491_v22, %v374_v23 }
 0x212   : > { %v506_v25 = vpop.f32.mrf.mxu0 }
 0x213   : > { %380 = vst [vmem:[%s270_s14] sm:$0xff] %v375_v24 }
 0x214   : > { %v377_v26 = vpop.f32.mrf.mxu0 }
 0x216   : > { %v507_v27 = vpop.f32.mrf.mxu0 }
 0x217 PF: > { %s15_s20 = sadd.s32 1, %s560_s20   ;;  %s655_s18 = smov %s556_s19 }
 0x218   : > { %p12_p5 = scmp.ge.s32.totalorder %s15_s20, 4   ;;  %s656_s19 = smov %s658_s21 }
 0x21a   :  { %14 = sbr.rel (!%p12_p5) target bundleno = 2 (0x2), region = 80 }

</bundles_post_ra>
